<compile_context>
chip_gen: v6e
topology: v6e:2x2x1
jax: 0.10.0
libtpu: 0.0.40
codegen_flags: <defaults>
</compile_context>

<pallas_src>
import functools

import jax
import jax.numpy as jnp
from jax import lax
from jax.experimental import pallas as pl
from jax.experimental.pallas import tpu as pltpu

_F_IN = 11                     # input / reconstruction features
_LANES = 128                   # TPU lane width
_CHUNK = 16                    # sublanes per inner-loop chunk (2 f32 vregs per row;
                               # also the native bf16 sublane tile)
_UNIT_ROWS = _CHUNK * _LANES   # 2048 rows: granularity of all block sizes

# (fan_in, fan_out) of the six Linear layers; weights kept in PyTorch (out, in) layout.
_LAYERS = ((11, 4), (4, 3), (3, 1), (1, 3), (3, 4), (4, 11))


def _param_offsets():
    offs, o = [], 0
    for fin, fout in _LAYERS:
        w_off = o
        o += fin * fout
        b_off = o
        o += fout
        offs.append((w_off, b_off, fin, fout))
    return tuple(offs), o


_OFFSETS, _N_PARAMS = _param_offsets()          # 144 scalars total


def _cdiv(a, b):
    return -(-a // b)


# --------------------------------------------------------------------------- #
# Kernel
# --------------------------------------------------------------------------- #
def _sigmoid_eup(z):
    # Exact identity: sigmoid(z) == 0.5 * (tanh(z / 2) + 1).  Keeps the
    # transcendental on the EUP instead of exp + f32 Newton divide on the VALU.
    return 0.5 * (jnp.tanh(0.5 * z) + 1.0)


def _linear(rows, p_ref, spec, act=None, store=None):
    """rows: list of (CHUNK, 128) f32 slabs, one per input feature.
    Weights/biases are scalar SMEM reads (p_ref[w_off + j*fin + k]).
    Fully unrolled (dims <= 11): pure VPU MACs, no MXU.  If `store` is given,
    each output row is written immediately (keeps the live vreg set small)."""
    w_off, b_off, fin, fout = spec
    outs = []
    for j in range(fout):
        acc = rows[0] * p_ref[w_off + j * fin]
        for k in range(1, fin):
            acc = acc + rows[k] * p_ref[w_off + j * fin + k]
        acc = acc + p_ref[b_off + j]
        if act is not None:
            acc = act(acc)
        if store is not None:
            store(j, acc)
        else:
            outs.append(acc)
    return outs


def autoencoder_kernel(p_ref, x_ref, enc_ref, dec_ref):
    """p_ref: (144,) f32 SMEM.  x_ref: (11, gb, 128) VMEM block (batch on lanes).
    enc_ref: (1, gb, 128) f32.  dec_ref: (11, gb, 128) in the I/O dtype."""
    gb = x_ref.shape[1]

    def chunk_body(c, carry):
        # One 16-sublane (2048-sample) chunk: the whole 6-layer MLP stays in vregs.
        sl = pl.ds(pl.multiple_of(c * _CHUNK, _CHUNK), _CHUNK)
        x = [x_ref[f, sl, :].astype(jnp.float32) for f in range(_F_IN)]

        # ---------------- encoder ----------------
        h = _linear(x, p_ref, _OFFSETS[0], jnp.tanh)        # 11 -> 4
        h = _linear(h, p_ref, _OFFSETS[1], jnp.tanh)        # 4  -> 3
        e = _linear(h, p_ref, _OFFSETS[2])                   # 3  -> 1
        enc_ref[0, sl, :] = e[0].astype(enc_ref.dtype)       # dense unmasked store

        # ---------------- decoder ----------------
        d = _linear(e, p_ref, _OFFSETS[3], jnp.tanh)         # 1 -> 3
        d = _linear(d, p_ref, _OFFSETS[4], jnp.tanh)         # 3 -> 4

        def _store_dec(j, v):                                # 4 -> 11, row-by-row
            dec_ref[j, sl, :] = v.astype(dec_ref.dtype)

        _linear(d, p_ref, _OFFSETS[5], _sigmoid_eup, store=_store_dec)
        return carry

    lax.fori_loop(0, gb // _CHUNK, chunk_body, 0)


# --------------------------------------------------------------------------- #
# Wrappers
# --------------------------------------------------------------------------- #
def _choose_block_rows(batch, max_block_rows, min_grid_steps):
    """Blocks are multiples of one 2048-row chunk, derived from the batch so the
    padding waste is bounded by one block, and split into >= min_grid_steps grid
    steps when the batch allows (so both v7x TensorCores get work)."""
    units = _cdiv(batch, _UNIT_ROWS)
    max_units = max(max_block_rows // _UNIT_ROWS, 1)
    n_steps = max(_cdiv(units, max_units), min(units, max(min_grid_steps, 1)))
    return _cdiv(units, n_steps) * _UNIT_ROWS


def pack_params(params):
    """Flatten the 12 (w, b) tensors (PyTorch (out,in) layout) into one 1-D f32
    vector the kernel reads from SMEM (1-D avoids the [8,128]-word padding a
    2-D SMEM ref pays per tiny matrix)."""
    flat = []
    for i, (fin, fout) in enumerate(_LAYERS):
        w, b = params[2 * i], params[2 * i + 1]
        assert w.shape == (fout, fin) and b.shape == (fout,)
        flat.append(jnp.asarray(w, jnp.float32).reshape(-1))
        flat.append(jnp.asarray(b, jnp.float32).reshape(-1))
    return jnp.concatenate(flat)


def _forward_feature_major(x_fm, params, max_block_rows, min_grid_steps):
    f, batch = x_fm.shape
    assert f == _F_IN
    if x_fm.dtype not in (jnp.float32, jnp.bfloat16):
        x_fm = x_fm.astype(jnp.float32)

    block_rows = _choose_block_rows(batch, max_block_rows, min_grid_steps)
    gb = block_rows // _LANES                       # lane groups per grid step
    n_groups = _cdiv(batch, _LANES)                 # pad only to one lane group
    padded_b = n_groups * _LANES
    if padded_b != batch:
        x_fm = jnp.pad(x_fm, ((0, 0), (0, padded_b - batch)))
    x_lanes = x_fm.reshape(_F_IN, n_groups, _LANES)  # free reshape, no transpose

    # Ragged final block is fine: OOB reads feed elementwise ops in dead lanes,
    # OOB writes are masked by Pallas on writeback.
    grid = (_cdiv(n_groups, gb),)

    enc_lanes, dec_lanes = pl.pallas_call(
        autoencoder_kernel,
        grid=grid,
        in_specs=[
            pl.BlockSpec((_N_PARAMS,), lambda i: (0,),
                         memory_space=pltpu.MemorySpace.SMEM),
            pl.BlockSpec((_F_IN, gb, _LANES), lambda i: (0, i, 0)),
        ],
        out_specs=(
            pl.BlockSpec((1, gb, _LANES), lambda i: (0, i, 0)),
            pl.BlockSpec((_F_IN, gb, _LANES), lambda i: (0, i, 0)),
        ),
        out_shape=(
            jax.ShapeDtypeStruct((1, n_groups, _LANES), jnp.float32),
            jax.ShapeDtypeStruct((_F_IN, n_groups, _LANES), x_lanes.dtype),
        ),
        compiler_params=pltpu.CompilerParams(
            dimension_semantics=("parallel",),        # shards batch over v7x's 2 TCs
            vmem_limit_bytes=32 * 1024 * 1024,        # v5e scoped default is 16 MiB
        ),
    )(pack_params(params), x_lanes)

    enc_fm = enc_lanes.reshape(1, padded_b)
    dec_fm = dec_lanes.reshape(_F_IN, padded_b)
    if padded_b != batch:
        enc_fm = enc_fm[:, :batch]
        dec_fm = dec_fm[:, :batch]
    return enc_fm, dec_fm


@functools.partial(jax.jit, static_argnames=("max_block_rows", "min_grid_steps"))
def autoencoder_forward_feature_major(x_fm, params, *, max_block_rows=65536,
                                      min_grid_steps=4):
    """Fast path.  x_fm: (11, B) feature-major; returns ((1, B), (11, B)).
    No HBM transpose passes anywhere (only free reshapes around the kernel)."""
    return _forward_feature_major(x_fm, params, max_block_rows, min_grid_steps)


@functools.partial(jax.jit, static_argnames=("max_block_rows", "min_grid_steps"))
def autoencoder_forward(x, params, *, max_block_rows=65536, min_grid_steps=4):
    """Drop-in PyTorch-parity wrapper.  x: (B, 11); returns ((B, 1), (B, 11)).
    NOTE: the (B,11)<->(11,B) layout changes cost two XLA HBM transpose passes;
    prefer `autoencoder_forward_feature_major` when producers/consumers allow."""
    enc_fm, dec_fm = _forward_feature_major(x.T, params, max_block_rows,
                                            min_grid_steps)
    return enc_fm.T, dec_fm.T


# --------------------------------------------------------------------------- #
# Parameter init & pure-JAX reference (PyTorch-equivalent)
# --------------------------------------------------------------------------- #
def init_params(key):
    """PyTorch nn.Linear default init U(-k, k), k = 1/sqrt(fan_in); weights in
    PyTorch layout (out_features, in_features)."""
    params = []
    for fan_in, fan_out in _LAYERS:
        key, kw, kb = jax.random.split(key, 3)
        bound = 1.0 / jnp.sqrt(jnp.float32(fan_in))
        w = jax.random.uniform(kw, (fan_out, fan_in), jnp.float32, -bound, bound)
        b = jax.random.uniform(kb, (fan_out,), jnp.float32, -bound, bound)
        params.extend([w, b])
    return tuple(params)


def reference_forward(x, params):
    w1, b1, w2, b2, w3, b3, w4, b4, w5, b5, w6, b6 = params
    h = jnp.tanh(x @ w1.T + b1)
    h = jnp.tanh(h @ w2.T + b2)
    enc = h @ w3.T + b3
    d = jnp.tanh(enc @ w4.T + b4)
    d = jnp.tanh(d @ w5.T + b5)
    dec = jax.nn.sigmoid(d @ w6.T + b6)
    return enc, dec


if __name__ == "__main__":
    key = jax.random.PRNGKey(0)
    key, kx, kx2 = jax.random.split(key, 3)
    params = init_params(key)

    # 1) Drop-in (B, 11) API, ragged batch (2000 rows -> one 2048-row block).
    B = 2000
    x = jax.random.normal(kx, (B, _F_IN), jnp.float32)
    enc, dec = autoencoder_forward(x, params)
    jax.block_until_ready((enc, dec))
    enc_ref, dec_ref = reference_forward(x, params)
    assert enc.shape == (B, 1) and dec.shape == (B, _F_IN)
    assert jnp.allclose(enc, enc_ref, atol=1e-5, rtol=1e-5)
    assert jnp.allclose(dec, dec_ref, atol=1e-5, rtol=1e-5)

    # 2) Feature-major fast path (no wrapper transposes): 6400 rows = 50 lane
    #    groups -> 4 grid steps of 16-group blocks with a ragged final block.
    B2 = 6400
    x2 = jax.random.normal(kx2, (_F_IN, B2), jnp.float32)
    enc2, dec2 = autoencoder_forward_feature_major(x2, params)
    jax.block_until_ready((enc2, dec2))
    enc2_ref, dec2_ref = reference_forward(x2.T, params)
    assert enc2.shape == (1, B2) and dec2.shape == (_F_IN, B2)
    assert jnp.allclose(enc2, enc2_ref.T, atol=1e-5, rtol=1e-5)
    assert jnp.allclose(dec2, dec2_ref.T, atol=1e-5, rtol=1e-5)

    print("KERNEL_OK")
</pallas_src>

<mosaic_0001>
module attributes {stable_mosaic.version = 11 : i64} {
  func.func @autoencoder_kernel(%arg0: i32, %arg1: memref<144xf32, #tpu.memory_space<smem>>, %arg2: memref<11x16x128xf32, #tpu.memory_space<vmem>>, %arg3: memref<1x16x128xf32, #tpu.memory_space<vmem>>, %arg4: memref<11x16x128xf32, #tpu.memory_space<vmem>>) attributes {dimension_semantics = [#tpu.dimension_semantics<parallel>], iteration_bounds = array<i64: 1>, scalar_prefetch = 0 : i64, scratch_operands = 0 : i64, tpu.core_type = #tpu.core_type<tc>, window_params = [{transform_indices = @transform_0, window_bounds = array<i64: 144>}, {transform_indices = @transform_1, window_bounds = array<i64: 11, 16, 128>}, {transform_indices = @transform_2, window_bounds = array<i64: 1, 16, 128>}, {transform_indices = @transform_3, window_bounds = array<i64: 11, 16, 128>}]} {
    %c0_i32 = arith.constant 0 : i32
    %c16_i32 = arith.constant 16 : i32
    %0 = arith.muli %c0_i32, %c16_i32 : i32
    %1 = tpu.assume_multiple %0, 16 : i32
    %c0 = arith.constant 0 : index
    %2 = arith.index_cast %1 : i32 to index
    %c0_0 = arith.constant 0 : index
    %3 = vector.load %arg2[%c0, %2, %c0_0] : memref<11x16x128xf32, #tpu.memory_space<vmem>>, vector<1x16x128xf32>
    %4 = vector.shape_cast %3 : vector<1x16x128xf32> to vector<16x128xf32>
    %c1 = arith.constant 1 : index
    %5 = arith.index_cast %1 : i32 to index
    %c0_1 = arith.constant 0 : index
    %6 = vector.load %arg2[%c1, %5, %c0_1] : memref<11x16x128xf32, #tpu.memory_space<vmem>>, vector<1x16x128xf32>
    %7 = vector.shape_cast %6 : vector<1x16x128xf32> to vector<16x128xf32>
    %c2 = arith.constant 2 : index
    %8 = arith.index_cast %1 : i32 to index
    %c0_2 = arith.constant 0 : index
    %9 = vector.load %arg2[%c2, %8, %c0_2] : memref<11x16x128xf32, #tpu.memory_space<vmem>>, vector<1x16x128xf32>
    %10 = vector.shape_cast %9 : vector<1x16x128xf32> to vector<16x128xf32>
    %c3 = arith.constant 3 : index
    %11 = arith.index_cast %1 : i32 to index
    %c0_3 = arith.constant 0 : index
    %12 = vector.load %arg2[%c3, %11, %c0_3] : memref<11x16x128xf32, #tpu.memory_space<vmem>>, vector<1x16x128xf32>
    %13 = vector.shape_cast %12 : vector<1x16x128xf32> to vector<16x128xf32>
    %c4 = arith.constant 4 : index
    %14 = arith.index_cast %1 : i32 to index
    %c0_4 = arith.constant 0 : index
    %15 = vector.load %arg2[%c4, %14, %c0_4] : memref<11x16x128xf32, #tpu.memory_space<vmem>>, vector<1x16x128xf32>
    %16 = vector.shape_cast %15 : vector<1x16x128xf32> to vector<16x128xf32>
    %c5 = arith.constant 5 : index
    %17 = arith.index_cast %1 : i32 to index
    %c0_5 = arith.constant 0 : index
    %18 = vector.load %arg2[%c5, %17, %c0_5] : memref<11x16x128xf32, #tpu.memory_space<vmem>>, vector<1x16x128xf32>
    %19 = vector.shape_cast %18 : vector<1x16x128xf32> to vector<16x128xf32>
    %c6 = arith.constant 6 : index
    %20 = arith.index_cast %1 : i32 to index
    %c0_6 = arith.constant 0 : index
    %21 = vector.load %arg2[%c6, %20, %c0_6] : memref<11x16x128xf32, #tpu.memory_space<vmem>>, vector<1x16x128xf32>
    %22 = vector.shape_cast %21 : vector<1x16x128xf32> to vector<16x128xf32>
    %c7 = arith.constant 7 : index
    %23 = arith.index_cast %1 : i32 to index
    %c0_7 = arith.constant 0 : index
    %24 = vector.load %arg2[%c7, %23, %c0_7] : memref<11x16x128xf32, #tpu.memory_space<vmem>>, vector<1x16x128xf32>
    %25 = vector.shape_cast %24 : vector<1x16x128xf32> to vector<16x128xf32>
    %c8 = arith.constant 8 : index
    %26 = arith.index_cast %1 : i32 to index
    %c0_8 = arith.constant 0 : index
    %27 = vector.load %arg2[%c8, %26, %c0_8] : memref<11x16x128xf32, #tpu.memory_space<vmem>>, vector<1x16x128xf32>
    %28 = vector.shape_cast %27 : vector<1x16x128xf32> to vector<16x128xf32>
    %c9 = arith.constant 9 : index
    %29 = arith.index_cast %1 : i32 to index
    %c0_9 = arith.constant 0 : index
    %30 = vector.load %arg2[%c9, %29, %c0_9] : memref<11x16x128xf32, #tpu.memory_space<vmem>>, vector<1x16x128xf32>
    %31 = vector.shape_cast %30 : vector<1x16x128xf32> to vector<16x128xf32>
    %c10 = arith.constant 10 : index
    %32 = arith.index_cast %1 : i32 to index
    %c0_10 = arith.constant 0 : index
    %33 = vector.load %arg2[%c10, %32, %c0_10] : memref<11x16x128xf32, #tpu.memory_space<vmem>>, vector<1x16x128xf32>
    %34 = vector.shape_cast %33 : vector<1x16x128xf32> to vector<16x128xf32>
    %c0_11 = arith.constant 0 : index
    %35 = memref.load %arg1[%c0_11] : memref<144xf32, #tpu.memory_space<smem>>
    %36 = vector.broadcast %35 : f32 to vector<16x128xf32>
    %37 = arith.mulf %4, %36 : vector<16x128xf32>
    %c1_12 = arith.constant 1 : index
    %38 = memref.load %arg1[%c1_12] : memref<144xf32, #tpu.memory_space<smem>>
    %39 = vector.broadcast %38 : f32 to vector<16x128xf32>
    %40 = arith.mulf %7, %39 : vector<16x128xf32>
    %41 = arith.addf %37, %40 : vector<16x128xf32>
    %c2_13 = arith.constant 2 : index
    %42 = memref.load %arg1[%c2_13] : memref<144xf32, #tpu.memory_space<smem>>
    %43 = vector.broadcast %42 : f32 to vector<16x128xf32>
    %44 = arith.mulf %10, %43 : vector<16x128xf32>
    %45 = arith.addf %41, %44 : vector<16x128xf32>
    %c3_14 = arith.constant 3 : index
    %46 = memref.load %arg1[%c3_14] : memref<144xf32, #tpu.memory_space<smem>>
    %47 = vector.broadcast %46 : f32 to vector<16x128xf32>
    %48 = arith.mulf %13, %47 : vector<16x128xf32>
    %49 = arith.addf %45, %48 : vector<16x128xf32>
    %c4_15 = arith.constant 4 : index
    %50 = memref.load %arg1[%c4_15] : memref<144xf32, #tpu.memory_space<smem>>
    %51 = vector.broadcast %50 : f32 to vector<16x128xf32>
    %52 = arith.mulf %16, %51 : vector<16x128xf32>
    %53 = arith.addf %49, %52 : vector<16x128xf32>
    %c5_16 = arith.constant 5 : index
    %54 = memref.load %arg1[%c5_16] : memref<144xf32, #tpu.memory_space<smem>>
    %55 = vector.broadcast %54 : f32 to vector<16x128xf32>
    %56 = arith.mulf %19, %55 : vector<16x128xf32>
    %57 = arith.addf %53, %56 : vector<16x128xf32>
    %c6_17 = arith.constant 6 : index
    %58 = memref.load %arg1[%c6_17] : memref<144xf32, #tpu.memory_space<smem>>
    %59 = vector.broadcast %58 : f32 to vector<16x128xf32>
    %60 = arith.mulf %22, %59 : vector<16x128xf32>
    %61 = arith.addf %57, %60 : vector<16x128xf32>
    %c7_18 = arith.constant 7 : index
    %62 = memref.load %arg1[%c7_18] : memref<144xf32, #tpu.memory_space<smem>>
    %63 = vector.broadcast %62 : f32 to vector<16x128xf32>
    %64 = arith.mulf %25, %63 : vector<16x128xf32>
    %65 = arith.addf %61, %64 : vector<16x128xf32>
    %c8_19 = arith.constant 8 : index
    %66 = memref.load %arg1[%c8_19] : memref<144xf32, #tpu.memory_space<smem>>
    %67 = vector.broadcast %66 : f32 to vector<16x128xf32>
    %68 = arith.mulf %28, %67 : vector<16x128xf32>
    %69 = arith.addf %65, %68 : vector<16x128xf32>
    %c9_20 = arith.constant 9 : index
    %70 = memref.load %arg1[%c9_20] : memref<144xf32, #tpu.memory_space<smem>>
    %71 = vector.broadcast %70 : f32 to vector<16x128xf32>
    %72 = arith.mulf %31, %71 : vector<16x128xf32>
    %73 = arith.addf %69, %72 : vector<16x128xf32>
    %c10_21 = arith.constant 10 : index
    %74 = memref.load %arg1[%c10_21] : memref<144xf32, #tpu.memory_space<smem>>
    %75 = vector.broadcast %74 : f32 to vector<16x128xf32>
    %76 = arith.mulf %34, %75 : vector<16x128xf32>
    %77 = arith.addf %73, %76 : vector<16x128xf32>
    %c44 = arith.constant 44 : index
    %78 = memref.load %arg1[%c44] : memref<144xf32, #tpu.memory_space<smem>>
    %79 = vector.broadcast %78 : f32 to vector<16x128xf32>
    %80 = arith.addf %77, %79 : vector<16x128xf32>
    %81 = math.tanh %80 : vector<16x128xf32>
    %c11 = arith.constant 11 : index
    %82 = memref.load %arg1[%c11] : memref<144xf32, #tpu.memory_space<smem>>
    %83 = vector.broadcast %82 : f32 to vector<16x128xf32>
    %84 = arith.mulf %4, %83 : vector<16x128xf32>
    %c12 = arith.constant 12 : index
    %85 = memref.load %arg1[%c12] : memref<144xf32, #tpu.memory_space<smem>>
    %86 = vector.broadcast %85 : f32 to vector<16x128xf32>
    %87 = arith.mulf %7, %86 : vector<16x128xf32>
    %88 = arith.addf %84, %87 : vector<16x128xf32>
    %c13 = arith.constant 13 : index
    %89 = memref.load %arg1[%c13] : memref<144xf32, #tpu.memory_space<smem>>
    %90 = vector.broadcast %89 : f32 to vector<16x128xf32>
    %91 = arith.mulf %10, %90 : vector<16x128xf32>
    %92 = arith.addf %88, %91 : vector<16x128xf32>
    %c14 = arith.constant 14 : index
    %93 = memref.load %arg1[%c14] : memref<144xf32, #tpu.memory_space<smem>>
    %94 = vector.broadcast %93 : f32 to vector<16x128xf32>
    %95 = arith.mulf %13, %94 : vector<16x128xf32>
    %96 = arith.addf %92, %95 : vector<16x128xf32>
    %c15 = arith.constant 15 : index
    %97 = memref.load %arg1[%c15] : memref<144xf32, #tpu.memory_space<smem>>
    %98 = vector.broadcast %97 : f32 to vector<16x128xf32>
    %99 = arith.mulf %16, %98 : vector<16x128xf32>
    %100 = arith.addf %96, %99 : vector<16x128xf32>
    %c16 = arith.constant 16 : index
    %101 = memref.load %arg1[%c16] : memref<144xf32, #tpu.memory_space<smem>>
    %102 = vector.broadcast %101 : f32 to vector<16x128xf32>
    %103 = arith.mulf %19, %102 : vector<16x128xf32>
    %104 = arith.addf %100, %103 : vector<16x128xf32>
    %c17 = arith.constant 17 : index
    %105 = memref.load %arg1[%c17] : memref<144xf32, #tpu.memory_space<smem>>
    %106 = vector.broadcast %105 : f32 to vector<16x128xf32>
    %107 = arith.mulf %22, %106 : vector<16x128xf32>
    %108 = arith.addf %104, %107 : vector<16x128xf32>
    %c18 = arith.constant 18 : index
    %109 = memref.load %arg1[%c18] : memref<144xf32, #tpu.memory_space<smem>>
    %110 = vector.broadcast %109 : f32 to vector<16x128xf32>
    %111 = arith.mulf %25, %110 : vector<16x128xf32>
    %112 = arith.addf %108, %111 : vector<16x128xf32>
    %c19 = arith.constant 19 : index
    %113 = memref.load %arg1[%c19] : memref<144xf32, #tpu.memory_space<smem>>
    %114 = vector.broadcast %113 : f32 to vector<16x128xf32>
    %115 = arith.mulf %28, %114 : vector<16x128xf32>
    %116 = arith.addf %112, %115 : vector<16x128xf32>
    %c20 = arith.constant 20 : index
    %117 = memref.load %arg1[%c20] : memref<144xf32, #tpu.memory_space<smem>>
    %118 = vector.broadcast %117 : f32 to vector<16x128xf32>
    %119 = arith.mulf %31, %118 : vector<16x128xf32>
    %120 = arith.addf %116, %119 : vector<16x128xf32>
    %c21 = arith.constant 21 : index
    %121 = memref.load %arg1[%c21] : memref<144xf32, #tpu.memory_space<smem>>
    %122 = vector.broadcast %121 : f32 to vector<16x128xf32>
    %123 = arith.mulf %34, %122 : vector<16x128xf32>
    %124 = arith.addf %120, %123 : vector<16x128xf32>
    %c45 = arith.constant 45 : index
    %125 = memref.load %arg1[%c45] : memref<144xf32, #tpu.memory_space<smem>>
    %126 = vector.broadcast %125 : f32 to vector<16x128xf32>
    %127 = arith.addf %124, %126 : vector<16x128xf32>
    %128 = math.tanh %127 : vector<16x128xf32>
    %c22 = arith.constant 22 : index
    %129 = memref.load %arg1[%c22] : memref<144xf32, #tpu.memory_space<smem>>
    %130 = vector.broadcast %129 : f32 to vector<16x128xf32>
    %131 = arith.mulf %4, %130 : vector<16x128xf32>
    %c23 = arith.constant 23 : index
    %132 = memref.load %arg1[%c23] : memref<144xf32, #tpu.memory_space<smem>>
    %133 = vector.broadcast %132 : f32 to vector<16x128xf32>
    %134 = arith.mulf %7, %133 : vector<16x128xf32>
    %135 = arith.addf %131, %134 : vector<16x128xf32>
    %c24 = arith.constant 24 : index
    %136 = memref.load %arg1[%c24] : memref<144xf32, #tpu.memory_space<smem>>
    %137 = vector.broadcast %136 : f32 to vector<16x128xf32>
    %138 = arith.mulf %10, %137 : vector<16x128xf32>
    %139 = arith.addf %135, %138 : vector<16x128xf32>
    %c25 = arith.constant 25 : index
    %140 = memref.load %arg1[%c25] : memref<144xf32, #tpu.memory_space<smem>>
    %141 = vector.broadcast %140 : f32 to vector<16x128xf32>
    %142 = arith.mulf %13, %141 : vector<16x128xf32>
    %143 = arith.addf %139, %142 : vector<16x128xf32>
    %c26 = arith.constant 26 : index
    %144 = memref.load %arg1[%c26] : memref<144xf32, #tpu.memory_space<smem>>
    %145 = vector.broadcast %144 : f32 to vector<16x128xf32>
    %146 = arith.mulf %16, %145 : vector<16x128xf32>
    %147 = arith.addf %143, %146 : vector<16x128xf32>
    %c27 = arith.constant 27 : index
    %148 = memref.load %arg1[%c27] : memref<144xf32, #tpu.memory_space<smem>>
    %149 = vector.broadcast %148 : f32 to vector<16x128xf32>
    %150 = arith.mulf %19, %149 : vector<16x128xf32>
    %151 = arith.addf %147, %150 : vector<16x128xf32>
    %c28 = arith.constant 28 : index
    %152 = memref.load %arg1[%c28] : memref<144xf32, #tpu.memory_space<smem>>
    %153 = vector.broadcast %152 : f32 to vector<16x128xf32>
    %154 = arith.mulf %22, %153 : vector<16x128xf32>
    %155 = arith.addf %151, %154 : vector<16x128xf32>
    %c29 = arith.constant 29 : index
    %156 = memref.load %arg1[%c29] : memref<144xf32, #tpu.memory_space<smem>>
    %157 = vector.broadcast %156 : f32 to vector<16x128xf32>
    %158 = arith.mulf %25, %157 : vector<16x128xf32>
    %159 = arith.addf %155, %158 : vector<16x128xf32>
    %c30 = arith.constant 30 : index
    %160 = memref.load %arg1[%c30] : memref<144xf32, #tpu.memory_space<smem>>
    %161 = vector.broadcast %160 : f32 to vector<16x128xf32>
    %162 = arith.mulf %28, %161 : vector<16x128xf32>
    %163 = arith.addf %159, %162 : vector<16x128xf32>
    %c31 = arith.constant 31 : index
    %164 = memref.load %arg1[%c31] : memref<144xf32, #tpu.memory_space<smem>>
    %165 = vector.broadcast %164 : f32 to vector<16x128xf32>
    %166 = arith.mulf %31, %165 : vector<16x128xf32>
    %167 = arith.addf %163, %166 : vector<16x128xf32>
    %c32 = arith.constant 32 : index
    %168 = memref.load %arg1[%c32] : memref<144xf32, #tpu.memory_space<smem>>
    %169 = vector.broadcast %168 : f32 to vector<16x128xf32>
    %170 = arith.mulf %34, %169 : vector<16x128xf32>
    %171 = arith.addf %167, %170 : vector<16x128xf32>
    %c46 = arith.constant 46 : index
    %172 = memref.load %arg1[%c46] : memref<144xf32, #tpu.memory_space<smem>>
    %173 = vector.broadcast %172 : f32 to vector<16x128xf32>
    %174 = arith.addf %171, %173 : vector<16x128xf32>
    %175 = math.tanh %174 : vector<16x128xf32>
    %c33 = arith.constant 33 : index
    %176 = memref.load %arg1[%c33] : memref<144xf32, #tpu.memory_space<smem>>
    %177 = vector.broadcast %176 : f32 to vector<16x128xf32>
    %178 = arith.mulf %4, %177 : vector<16x128xf32>
    %c34 = arith.constant 34 : index
    %179 = memref.load %arg1[%c34] : memref<144xf32, #tpu.memory_space<smem>>
    %180 = vector.broadcast %179 : f32 to vector<16x128xf32>
    %181 = arith.mulf %7, %180 : vector<16x128xf32>
    %182 = arith.addf %178, %181 : vector<16x128xf32>
    %c35 = arith.constant 35 : index
    %183 = memref.load %arg1[%c35] : memref<144xf32, #tpu.memory_space<smem>>
    %184 = vector.broadcast %183 : f32 to vector<16x128xf32>
    %185 = arith.mulf %10, %184 : vector<16x128xf32>
    %186 = arith.addf %182, %185 : vector<16x128xf32>
    %c36 = arith.constant 36 : index
    %187 = memref.load %arg1[%c36] : memref<144xf32, #tpu.memory_space<smem>>
    %188 = vector.broadcast %187 : f32 to vector<16x128xf32>
    %189 = arith.mulf %13, %188 : vector<16x128xf32>
    %190 = arith.addf %186, %189 : vector<16x128xf32>
    %c37 = arith.constant 37 : index
    %191 = memref.load %arg1[%c37] : memref<144xf32, #tpu.memory_space<smem>>
    %192 = vector.broadcast %191 : f32 to vector<16x128xf32>
    %193 = arith.mulf %16, %192 : vector<16x128xf32>
    %194 = arith.addf %190, %193 : vector<16x128xf32>
    %c38 = arith.constant 38 : index
    %195 = memref.load %arg1[%c38] : memref<144xf32, #tpu.memory_space<smem>>
    %196 = vector.broadcast %195 : f32 to vector<16x128xf32>
    %197 = arith.mulf %19, %196 : vector<16x128xf32>
    %198 = arith.addf %194, %197 : vector<16x128xf32>
    %c39 = arith.constant 39 : index
    %199 = memref.load %arg1[%c39] : memref<144xf32, #tpu.memory_space<smem>>
    %200 = vector.broadcast %199 : f32 to vector<16x128xf32>
    %201 = arith.mulf %22, %200 : vector<16x128xf32>
    %202 = arith.addf %198, %201 : vector<16x128xf32>
    %c40 = arith.constant 40 : index
    %203 = memref.load %arg1[%c40] : memref<144xf32, #tpu.memory_space<smem>>
    %204 = vector.broadcast %203 : f32 to vector<16x128xf32>
    %205 = arith.mulf %25, %204 : vector<16x128xf32>
    %206 = arith.addf %202, %205 : vector<16x128xf32>
    %c41 = arith.constant 41 : index
    %207 = memref.load %arg1[%c41] : memref<144xf32, #tpu.memory_space<smem>>
    %208 = vector.broadcast %207 : f32 to vector<16x128xf32>
    %209 = arith.mulf %28, %208 : vector<16x128xf32>
    %210 = arith.addf %206, %209 : vector<16x128xf32>
    %c42 = arith.constant 42 : index
    %211 = memref.load %arg1[%c42] : memref<144xf32, #tpu.memory_space<smem>>
    %212 = vector.broadcast %211 : f32 to vector<16x128xf32>
    %213 = arith.mulf %31, %212 : vector<16x128xf32>
    %214 = arith.addf %210, %213 : vector<16x128xf32>
    %c43 = arith.constant 43 : index
    %215 = memref.load %arg1[%c43] : memref<144xf32, #tpu.memory_space<smem>>
    %216 = vector.broadcast %215 : f32 to vector<16x128xf32>
    %217 = arith.mulf %34, %216 : vector<16x128xf32>
    %218 = arith.addf %214, %217 : vector<16x128xf32>
    %c47 = arith.constant 47 : index
    %219 = memref.load %arg1[%c47] : memref<144xf32, #tpu.memory_space<smem>>
    %220 = vector.broadcast %219 : f32 to vector<16x128xf32>
    %221 = arith.addf %218, %220 : vector<16x128xf32>
    %222 = math.tanh %221 : vector<16x128xf32>
    %c48 = arith.constant 48 : index
    %223 = memref.load %arg1[%c48] : memref<144xf32, #tpu.memory_space<smem>>
    %224 = vector.broadcast %223 : f32 to vector<16x128xf32>
    %225 = arith.mulf %81, %224 : vector<16x128xf32>
    %c49 = arith.constant 49 : index
    %226 = memref.load %arg1[%c49] : memref<144xf32, #tpu.memory_space<smem>>
    %227 = vector.broadcast %226 : f32 to vector<16x128xf32>
    %228 = arith.mulf %128, %227 : vector<16x128xf32>
    %229 = arith.addf %225, %228 : vector<16x128xf32>
    %c50 = arith.constant 50 : index
    %230 = memref.load %arg1[%c50] : memref<144xf32, #tpu.memory_space<smem>>
    %231 = vector.broadcast %230 : f32 to vector<16x128xf32>
    %232 = arith.mulf %175, %231 : vector<16x128xf32>
    %233 = arith.addf %229, %232 : vector<16x128xf32>
    %c51 = arith.constant 51 : index
    %234 = memref.load %arg1[%c51] : memref<144xf32, #tpu.memory_space<smem>>
    %235 = vector.broadcast %234 : f32 to vector<16x128xf32>
    %236 = arith.mulf %222, %235 : vector<16x128xf32>
    %237 = arith.addf %233, %236 : vector<16x128xf32>
    %c60 = arith.constant 60 : index
    %238 = memref.load %arg1[%c60] : memref<144xf32, #tpu.memory_space<smem>>
    %239 = vector.broadcast %238 : f32 to vector<16x128xf32>
    %240 = arith.addf %237, %239 : vector<16x128xf32>
    %241 = math.tanh %240 : vector<16x128xf32>
    %c52 = arith.constant 52 : index
    %242 = memref.load %arg1[%c52] : memref<144xf32, #tpu.memory_space<smem>>
    %243 = vector.broadcast %242 : f32 to vector<16x128xf32>
    %244 = arith.mulf %81, %243 : vector<16x128xf32>
    %c53 = arith.constant 53 : index
    %245 = memref.load %arg1[%c53] : memref<144xf32, #tpu.memory_space<smem>>
    %246 = vector.broadcast %245 : f32 to vector<16x128xf32>
    %247 = arith.mulf %128, %246 : vector<16x128xf32>
    %248 = arith.addf %244, %247 : vector<16x128xf32>
    %c54 = arith.constant 54 : index
    %249 = memref.load %arg1[%c54] : memref<144xf32, #tpu.memory_space<smem>>
    %250 = vector.broadcast %249 : f32 to vector<16x128xf32>
    %251 = arith.mulf %175, %250 : vector<16x128xf32>
    %252 = arith.addf %248, %251 : vector<16x128xf32>
    %c55 = arith.constant 55 : index
    %253 = memref.load %arg1[%c55] : memref<144xf32, #tpu.memory_space<smem>>
    %254 = vector.broadcast %253 : f32 to vector<16x128xf32>
    %255 = arith.mulf %222, %254 : vector<16x128xf32>
    %256 = arith.addf %252, %255 : vector<16x128xf32>
    %c61 = arith.constant 61 : index
    %257 = memref.load %arg1[%c61] : memref<144xf32, #tpu.memory_space<smem>>
    %258 = vector.broadcast %257 : f32 to vector<16x128xf32>
    %259 = arith.addf %256, %258 : vector<16x128xf32>
    %260 = math.tanh %259 : vector<16x128xf32>
    %c56 = arith.constant 56 : index
    %261 = memref.load %arg1[%c56] : memref<144xf32, #tpu.memory_space<smem>>
    %262 = vector.broadcast %261 : f32 to vector<16x128xf32>
    %263 = arith.mulf %81, %262 : vector<16x128xf32>
    %c57 = arith.constant 57 : index
    %264 = memref.load %arg1[%c57] : memref<144xf32, #tpu.memory_space<smem>>
    %265 = vector.broadcast %264 : f32 to vector<16x128xf32>
    %266 = arith.mulf %128, %265 : vector<16x128xf32>
    %267 = arith.addf %263, %266 : vector<16x128xf32>
    %c58 = arith.constant 58 : index
    %268 = memref.load %arg1[%c58] : memref<144xf32, #tpu.memory_space<smem>>
    %269 = vector.broadcast %268 : f32 to vector<16x128xf32>
    %270 = arith.mulf %175, %269 : vector<16x128xf32>
    %271 = arith.addf %267, %270 : vector<16x128xf32>
    %c59 = arith.constant 59 : index
    %272 = memref.load %arg1[%c59] : memref<144xf32, #tpu.memory_space<smem>>
    %273 = vector.broadcast %272 : f32 to vector<16x128xf32>
    %274 = arith.mulf %222, %273 : vector<16x128xf32>
    %275 = arith.addf %271, %274 : vector<16x128xf32>
    %c62 = arith.constant 62 : index
    %276 = memref.load %arg1[%c62] : memref<144xf32, #tpu.memory_space<smem>>
    %277 = vector.broadcast %276 : f32 to vector<16x128xf32>
    %278 = arith.addf %275, %277 : vector<16x128xf32>
    %279 = math.tanh %278 : vector<16x128xf32>
    %c63 = arith.constant 63 : index
    %280 = memref.load %arg1[%c63] : memref<144xf32, #tpu.memory_space<smem>>
    %281 = vector.broadcast %280 : f32 to vector<16x128xf32>
    %282 = arith.mulf %241, %281 : vector<16x128xf32>
    %c64 = arith.constant 64 : index
    %283 = memref.load %arg1[%c64] : memref<144xf32, #tpu.memory_space<smem>>
    %284 = vector.broadcast %283 : f32 to vector<16x128xf32>
    %285 = arith.mulf %260, %284 : vector<16x128xf32>
    %286 = arith.addf %282, %285 : vector<16x128xf32>
    %c65 = arith.constant 65 : index
    %287 = memref.load %arg1[%c65] : memref<144xf32, #tpu.memory_space<smem>>
    %288 = vector.broadcast %287 : f32 to vector<16x128xf32>
    %289 = arith.mulf %279, %288 : vector<16x128xf32>
    %290 = arith.addf %286, %289 : vector<16x128xf32>
    %c66 = arith.constant 66 : index
    %291 = memref.load %arg1[%c66] : memref<144xf32, #tpu.memory_space<smem>>
    %292 = vector.broadcast %291 : f32 to vector<16x128xf32>
    %293 = arith.addf %290, %292 : vector<16x128xf32>
    %c0_22 = arith.constant 0 : index
    %294 = arith.index_cast %1 : i32 to index
    %c0_23 = arith.constant 0 : index
    %295 = vector.load %arg3[%c0_22, %294, %c0_23] : memref<1x16x128xf32, #tpu.memory_space<vmem>>, vector<1x16x128xf32>
    %296 = vector.shape_cast %295 : vector<1x16x128xf32> to vector<16x128xf32>
    %297 = vector.shape_cast %293 : vector<16x128xf32> to vector<1x16x128xf32>
    tpu.vector_store %arg3[%c0_22, %294, %c0_23], %297 {strides = array<i32>} : memref<1x16x128xf32, #tpu.memory_space<vmem>>, vector<1x16x128xf32>,
    %c67 = arith.constant 67 : index
    %298 = memref.load %arg1[%c67] : memref<144xf32, #tpu.memory_space<smem>>
    %299 = vector.broadcast %298 : f32 to vector<16x128xf32>
    %300 = arith.mulf %293, %299 : vector<16x128xf32>
    %c70 = arith.constant 70 : index
    %301 = memref.load %arg1[%c70] : memref<144xf32, #tpu.memory_space<smem>>
    %302 = vector.broadcast %301 : f32 to vector<16x128xf32>
    %303 = arith.addf %300, %302 : vector<16x128xf32>
    %304 = math.tanh %303 : vector<16x128xf32>
    %c68 = arith.constant 68 : index
    %305 = memref.load %arg1[%c68] : memref<144xf32, #tpu.memory_space<smem>>
    %306 = vector.broadcast %305 : f32 to vector<16x128xf32>
    %307 = arith.mulf %293, %306 : vector<16x128xf32>
    %c71 = arith.constant 71 : index
    %308 = memref.load %arg1[%c71] : memref<144xf32, #tpu.memory_space<smem>>
    %309 = vector.broadcast %308 : f32 to vector<16x128xf32>
    %310 = arith.addf %307, %309 : vector<16x128xf32>
    %311 = math.tanh %310 : vector<16x128xf32>
    %c69 = arith.constant 69 : index
    %312 = memref.load %arg1[%c69] : memref<144xf32, #tpu.memory_space<smem>>
    %313 = vector.broadcast %312 : f32 to vector<16x128xf32>
    %314 = arith.mulf %293, %313 : vector<16x128xf32>
    %c72 = arith.constant 72 : index
    %315 = memref.load %arg1[%c72] : memref<144xf32, #tpu.memory_space<smem>>
    %316 = vector.broadcast %315 : f32 to vector<16x128xf32>
    %317 = arith.addf %314, %316 : vector<16x128xf32>
    %318 = math.tanh %317 : vector<16x128xf32>
    %c73 = arith.constant 73 : index
    %319 = memref.load %arg1[%c73] : memref<144xf32, #tpu.memory_space<smem>>
    %320 = vector.broadcast %319 : f32 to vector<16x128xf32>
    %321 = arith.mulf %304, %320 : vector<16x128xf32>
    %c74 = arith.constant 74 : index
    %322 = memref.load %arg1[%c74] : memref<144xf32, #tpu.memory_space<smem>>
    %323 = vector.broadcast %322 : f32 to vector<16x128xf32>
    %324 = arith.mulf %311, %323 : vector<16x128xf32>
    %325 = arith.addf %321, %324 : vector<16x128xf32>
    %c75 = arith.constant 75 : index
    %326 = memref.load %arg1[%c75] : memref<144xf32, #tpu.memory_space<smem>>
    %327 = vector.broadcast %326 : f32 to vector<16x128xf32>
    %328 = arith.mulf %318, %327 : vector<16x128xf32>
    %329 = arith.addf %325, %328 : vector<16x128xf32>
    %c85 = arith.constant 85 : index
    %330 = memref.load %arg1[%c85] : memref<144xf32, #tpu.memory_space<smem>>
    %331 = vector.broadcast %330 : f32 to vector<16x128xf32>
    %332 = arith.addf %329, %331 : vector<16x128xf32>
    %333 = math.tanh %332 : vector<16x128xf32>
    %c76 = arith.constant 76 : index
    %334 = memref.load %arg1[%c76] : memref<144xf32, #tpu.memory_space<smem>>
    %335 = vector.broadcast %334 : f32 to vector<16x128xf32>
    %336 = arith.mulf %304, %335 : vector<16x128xf32>
    %c77 = arith.constant 77 : index
    %337 = memref.load %arg1[%c77] : memref<144xf32, #tpu.memory_space<smem>>
    %338 = vector.broadcast %337 : f32 to vector<16x128xf32>
    %339 = arith.mulf %311, %338 : vector<16x128xf32>
    %340 = arith.addf %336, %339 : vector<16x128xf32>
    %c78 = arith.constant 78 : index
    %341 = memref.load %arg1[%c78] : memref<144xf32, #tpu.memory_space<smem>>
    %342 = vector.broadcast %341 : f32 to vector<16x128xf32>
    %343 = arith.mulf %318, %342 : vector<16x128xf32>
    %344 = arith.addf %340, %343 : vector<16x128xf32>
    %c86 = arith.constant 86 : index
    %345 = memref.load %arg1[%c86] : memref<144xf32, #tpu.memory_space<smem>>
    %346 = vector.broadcast %345 : f32 to vector<16x128xf32>
    %347 = arith.addf %344, %346 : vector<16x128xf32>
    %348 = math.tanh %347 : vector<16x128xf32>
    %c79 = arith.constant 79 : index
    %349 = memref.load %arg1[%c79] : memref<144xf32, #tpu.memory_space<smem>>
    %350 = vector.broadcast %349 : f32 to vector<16x128xf32>
    %351 = arith.mulf %304, %350 : vector<16x128xf32>
    %c80 = arith.constant 80 : index
    %352 = memref.load %arg1[%c80] : memref<144xf32, #tpu.memory_space<smem>>
    %353 = vector.broadcast %352 : f32 to vector<16x128xf32>
    %354 = arith.mulf %311, %353 : vector<16x128xf32>
    %355 = arith.addf %351, %354 : vector<16x128xf32>
    %c81 = arith.constant 81 : index
    %356 = memref.load %arg1[%c81] : memref<144xf32, #tpu.memory_space<smem>>
    %357 = vector.broadcast %356 : f32 to vector<16x128xf32>
    %358 = arith.mulf %318, %357 : vector<16x128xf32>
    %359 = arith.addf %355, %358 : vector<16x128xf32>
    %c87 = arith.constant 87 : index
    %360 = memref.load %arg1[%c87] : memref<144xf32, #tpu.memory_space<smem>>
    %361 = vector.broadcast %360 : f32 to vector<16x128xf32>
    %362 = arith.addf %359, %361 : vector<16x128xf32>
    %363 = math.tanh %362 : vector<16x128xf32>
    %c82 = arith.constant 82 : index
    %364 = memref.load %arg1[%c82] : memref<144xf32, #tpu.memory_space<smem>>
    %365 = vector.broadcast %364 : f32 to vector<16x128xf32>
    %366 = arith.mulf %304, %365 : vector<16x128xf32>
    %c83 = arith.constant 83 : index
    %367 = memref.load %arg1[%c83] : memref<144xf32, #tpu.memory_space<smem>>
    %368 = vector.broadcast %367 : f32 to vector<16x128xf32>
    %369 = arith.mulf %311, %368 : vector<16x128xf32>
    %370 = arith.addf %366, %369 : vector<16x128xf32>
    %c84 = arith.constant 84 : index
    %371 = memref.load %arg1[%c84] : memref<144xf32, #tpu.memory_space<smem>>
    %372 = vector.broadcast %371 : f32 to vector<16x128xf32>
    %373 = arith.mulf %318, %372 : vector<16x128xf32>
    %374 = arith.addf %370, %373 : vector<16x128xf32>
    %c88 = arith.constant 88 : index
    %375 = memref.load %arg1[%c88] : memref<144xf32, #tpu.memory_space<smem>>
    %376 = vector.broadcast %375 : f32 to vector<16x128xf32>
    %377 = arith.addf %374, %376 : vector<16x128xf32>
    %378 = math.tanh %377 : vector<16x128xf32>
    %c89 = arith.constant 89 : index
    %379 = memref.load %arg1[%c89] : memref<144xf32, #tpu.memory_space<smem>>
    %380 = vector.broadcast %379 : f32 to vector<16x128xf32>
    %381 = arith.mulf %333, %380 : vector<16x128xf32>
    %c90 = arith.constant 90 : index
    %382 = memref.load %arg1[%c90] : memref<144xf32, #tpu.memory_space<smem>>
    %383 = vector.broadcast %382 : f32 to vector<16x128xf32>
    %384 = arith.mulf %348, %383 : vector<16x128xf32>
    %385 = arith.addf %381, %384 : vector<16x128xf32>
    %c91 = arith.constant 91 : index
    %386 = memref.load %arg1[%c91] : memref<144xf32, #tpu.memory_space<smem>>
    %387 = vector.broadcast %386 : f32 to vector<16x128xf32>
    %388 = arith.mulf %363, %387 : vector<16x128xf32>
    %389 = arith.addf %385, %388 : vector<16x128xf32>
    %c92 = arith.constant 92 : index
    %390 = memref.load %arg1[%c92] : memref<144xf32, #tpu.memory_space<smem>>
    %391 = vector.broadcast %390 : f32 to vector<16x128xf32>
    %392 = arith.mulf %378, %391 : vector<16x128xf32>
    %393 = arith.addf %389, %392 : vector<16x128xf32>
    %c133 = arith.constant 133 : index
    %394 = memref.load %arg1[%c133] : memref<144xf32, #tpu.memory_space<smem>>
    %395 = vector.broadcast %394 : f32 to vector<16x128xf32>
    %396 = arith.addf %393, %395 : vector<16x128xf32>
    %cst = arith.constant 5.000000e-01 : f32
    %397 = vector.broadcast %cst : f32 to vector<16x128xf32>
    %398 = arith.mulf %397, %396 : vector<16x128xf32>
    %399 = math.tanh %398 : vector<16x128xf32>
    %cst_24 = arith.constant 1.000000e+00 : f32
    %400 = vector.broadcast %cst_24 : f32 to vector<16x128xf32>
    %401 = arith.addf %399, %400 : vector<16x128xf32>
    %cst_25 = arith.constant 5.000000e-01 : f32
    %402 = vector.broadcast %cst_25 : f32 to vector<16x128xf32>
    %403 = arith.mulf %402, %401 : vector<16x128xf32>
    %c0_26 = arith.constant 0 : index
    %404 = arith.index_cast %1 : i32 to index
    %c0_27 = arith.constant 0 : index
    %405 = vector.load %arg4[%c0_26, %404, %c0_27] : memref<11x16x128xf32, #tpu.memory_space<vmem>>, vector<1x16x128xf32>
    %406 = vector.shape_cast %405 : vector<1x16x128xf32> to vector<16x128xf32>
    %407 = vector.shape_cast %403 : vector<16x128xf32> to vector<1x16x128xf32>
    tpu.vector_store %arg4[%c0_26, %404, %c0_27], %407 {strides = array<i32>} : memref<11x16x128xf32, #tpu.memory_space<vmem>>, vector<1x16x128xf32>,
    %c93 = arith.constant 93 : index
    %408 = memref.load %arg1[%c93] : memref<144xf32, #tpu.memory_space<smem>>
    %409 = vector.broadcast %408 : f32 to vector<16x128xf32>
    %410 = arith.mulf %333, %409 : vector<16x128xf32>
    %c94 = arith.constant 94 : index
    %411 = memref.load %arg1[%c94] : memref<144xf32, #tpu.memory_space<smem>>
    %412 = vector.broadcast %411 : f32 to vector<16x128xf32>
    %413 = arith.mulf %348, %412 : vector<16x128xf32>
    %414 = arith.addf %410, %413 : vector<16x128xf32>
    %c95 = arith.constant 95 : index
    %415 = memref.load %arg1[%c95] : memref<144xf32, #tpu.memory_space<smem>>
    %416 = vector.broadcast %415 : f32 to vector<16x128xf32>
    %417 = arith.mulf %363, %416 : vector<16x128xf32>
    %418 = arith.addf %414, %417 : vector<16x128xf32>
    %c96 = arith.constant 96 : index
    %419 = memref.load %arg1[%c96] : memref<144xf32, #tpu.memory_space<smem>>
    %420 = vector.broadcast %419 : f32 to vector<16x128xf32>
    %421 = arith.mulf %378, %420 : vector<16x128xf32>
    %422 = arith.addf %418, %421 : vector<16x128xf32>
    %c134 = arith.constant 134 : index
    %423 = memref.load %arg1[%c134] : memref<144xf32, #tpu.memory_space<smem>>
    %424 = vector.broadcast %423 : f32 to vector<16x128xf32>
    %425 = arith.addf %422, %424 : vector<16x128xf32>
    %cst_28 = arith.constant 5.000000e-01 : f32
    %426 = vector.broadcast %cst_28 : f32 to vector<16x128xf32>
    %427 = arith.mulf %426, %425 : vector<16x128xf32>
    %428 = math.tanh %427 : vector<16x128xf32>
    %cst_29 = arith.constant 1.000000e+00 : f32
    %429 = vector.broadcast %cst_29 : f32 to vector<16x128xf32>
    %430 = arith.addf %428, %429 : vector<16x128xf32>
    %cst_30 = arith.constant 5.000000e-01 : f32
    %431 = vector.broadcast %cst_30 : f32 to vector<16x128xf32>
    %432 = arith.mulf %431, %430 : vector<16x128xf32>
    %c1_31 = arith.constant 1 : index
    %433 = arith.index_cast %1 : i32 to index
    %c0_32 = arith.constant 0 : index
    %434 = vector.load %arg4[%c1_31, %433, %c0_32] : memref<11x16x128xf32, #tpu.memory_space<vmem>>, vector<1x16x128xf32>
    %435 = vector.shape_cast %434 : vector<1x16x128xf32> to vector<16x128xf32>
    %436 = vector.shape_cast %432 : vector<16x128xf32> to vector<1x16x128xf32>
    tpu.vector_store %arg4[%c1_31, %433, %c0_32], %436 {strides = array<i32>} : memref<11x16x128xf32, #tpu.memory_space<vmem>>, vector<1x16x128xf32>,
    %c97 = arith.constant 97 : index
    %437 = memref.load %arg1[%c97] : memref<144xf32, #tpu.memory_space<smem>>
    %438 = vector.broadcast %437 : f32 to vector<16x128xf32>
    %439 = arith.mulf %333, %438 : vector<16x128xf32>
    %c98 = arith.constant 98 : index
    %440 = memref.load %arg1[%c98] : memref<144xf32, #tpu.memory_space<smem>>
    %441 = vector.broadcast %440 : f32 to vector<16x128xf32>
    %442 = arith.mulf %348, %441 : vector<16x128xf32>
    %443 = arith.addf %439, %442 : vector<16x128xf32>
    %c99 = arith.constant 99 : index
    %444 = memref.load %arg1[%c99] : memref<144xf32, #tpu.memory_space<smem>>
    %445 = vector.broadcast %444 : f32 to vector<16x128xf32>
    %446 = arith.mulf %363, %445 : vector<16x128xf32>
    %447 = arith.addf %443, %446 : vector<16x128xf32>
    %c100 = arith.constant 100 : index
    %448 = memref.load %arg1[%c100] : memref<144xf32, #tpu.memory_space<smem>>
    %449 = vector.broadcast %448 : f32 to vector<16x128xf32>
    %450 = arith.mulf %378, %449 : vector<16x128xf32>
    %451 = arith.addf %447, %450 : vector<16x128xf32>
    %c135 = arith.constant 135 : index
    %452 = memref.load %arg1[%c135] : memref<144xf32, #tpu.memory_space<smem>>
    %453 = vector.broadcast %452 : f32 to vector<16x128xf32>
    %454 = arith.addf %451, %453 : vector<16x128xf32>
    %cst_33 = arith.constant 5.000000e-01 : f32
    %455 = vector.broadcast %cst_33 : f32 to vector<16x128xf32>
    %456 = arith.mulf %455, %454 : vector<16x128xf32>
    %457 = math.tanh %456 : vector<16x128xf32>
    %cst_34 = arith.constant 1.000000e+00 : f32
    %458 = vector.broadcast %cst_34 : f32 to vector<16x128xf32>
    %459 = arith.addf %457, %458 : vector<16x128xf32>
    %cst_35 = arith.constant 5.000000e-01 : f32
    %460 = vector.broadcast %cst_35 : f32 to vector<16x128xf32>
    %461 = arith.mulf %460, %459 : vector<16x128xf32>
    %c2_36 = arith.constant 2 : index
    %462 = arith.index_cast %1 : i32 to index
    %c0_37 = arith.constant 0 : index
    %463 = vector.load %arg4[%c2_36, %462, %c0_37] : memref<11x16x128xf32, #tpu.memory_space<vmem>>, vector<1x16x128xf32>
    %464 = vector.shape_cast %463 : vector<1x16x128xf32> to vector<16x128xf32>
    %465 = vector.shape_cast %461 : vector<16x128xf32> to vector<1x16x128xf32>
    tpu.vector_store %arg4[%c2_36, %462, %c0_37], %465 {strides = array<i32>} : memref<11x16x128xf32, #tpu.memory_space<vmem>>, vector<1x16x128xf32>,
    %c101 = arith.constant 101 : index
    %466 = memref.load %arg1[%c101] : memref<144xf32, #tpu.memory_space<smem>>
    %467 = vector.broadcast %466 : f32 to vector<16x128xf32>
    %468 = arith.mulf %333, %467 : vector<16x128xf32>
    %c102 = arith.constant 102 : index
    %469 = memref.load %arg1[%c102] : memref<144xf32, #tpu.memory_space<smem>>
    %470 = vector.broadcast %469 : f32 to vector<16x128xf32>
    %471 = arith.mulf %348, %470 : vector<16x128xf32>
    %472 = arith.addf %468, %471 : vector<16x128xf32>
    %c103 = arith.constant 103 : index
    %473 = memref.load %arg1[%c103] : memref<144xf32, #tpu.memory_space<smem>>
    %474 = vector.broadcast %473 : f32 to vector<16x128xf32>
    %475 = arith.mulf %363, %474 : vector<16x128xf32>
    %476 = arith.addf %472, %475 : vector<16x128xf32>
    %c104 = arith.constant 104 : index
    %477 = memref.load %arg1[%c104] : memref<144xf32, #tpu.memory_space<smem>>
    %478 = vector.broadcast %477 : f32 to vector<16x128xf32>
    %479 = arith.mulf %378, %478 : vector<16x128xf32>
    %480 = arith.addf %476, %479 : vector<16x128xf32>
    %c136 = arith.constant 136 : index
    %481 = memref.load %arg1[%c136] : memref<144xf32, #tpu.memory_space<smem>>
    %482 = vector.broadcast %481 : f32 to vector<16x128xf32>
    %483 = arith.addf %480, %482 : vector<16x128xf32>
    %cst_38 = arith.constant 5.000000e-01 : f32
    %484 = vector.broadcast %cst_38 : f32 to vector<16x128xf32>
    %485 = arith.mulf %484, %483 : vector<16x128xf32>
    %486 = math.tanh %485 : vector<16x128xf32>
    %cst_39 = arith.constant 1.000000e+00 : f32
    %487 = vector.broadcast %cst_39 : f32 to vector<16x128xf32>
    %488 = arith.addf %486, %487 : vector<16x128xf32>
    %cst_40 = arith.constant 5.000000e-01 : f32
    %489 = vector.broadcast %cst_40 : f32 to vector<16x128xf32>
    %490 = arith.mulf %489, %488 : vector<16x128xf32>
    %c3_41 = arith.constant 3 : index
    %491 = arith.index_cast %1 : i32 to index
    %c0_42 = arith.constant 0 : index
    %492 = vector.load %arg4[%c3_41, %491, %c0_42] : memref<11x16x128xf32, #tpu.memory_space<vmem>>, vector<1x16x128xf32>
    %493 = vector.shape_cast %492 : vector<1x16x128xf32> to vector<16x128xf32>
    %494 = vector.shape_cast %490 : vector<16x128xf32> to vector<1x16x128xf32>
    tpu.vector_store %arg4[%c3_41, %491, %c0_42], %494 {strides = array<i32>} : memref<11x16x128xf32, #tpu.memory_space<vmem>>, vector<1x16x128xf32>,
    %c105 = arith.constant 105 : index
    %495 = memref.load %arg1[%c105] : memref<144xf32, #tpu.memory_space<smem>>
    %496 = vector.broadcast %495 : f32 to vector<16x128xf32>
    %497 = arith.mulf %333, %496 : vector<16x128xf32>
    %c106 = arith.constant 106 : index
    %498 = memref.load %arg1[%c106] : memref<144xf32, #tpu.memory_space<smem>>
    %499 = vector.broadcast %498 : f32 to vector<16x128xf32>
    %500 = arith.mulf %348, %499 : vector<16x128xf32>
    %501 = arith.addf %497, %500 : vector<16x128xf32>
    %c107 = arith.constant 107 : index
    %502 = memref.load %arg1[%c107] : memref<144xf32, #tpu.memory_space<smem>>
    %503 = vector.broadcast %502 : f32 to vector<16x128xf32>
    %504 = arith.mulf %363, %503 : vector<16x128xf32>
    %505 = arith.addf %501, %504 : vector<16x128xf32>
    %c108 = arith.constant 108 : index
    %506 = memref.load %arg1[%c108] : memref<144xf32, #tpu.memory_space<smem>>
    %507 = vector.broadcast %506 : f32 to vector<16x128xf32>
    %508 = arith.mulf %378, %507 : vector<16x128xf32>
    %509 = arith.addf %505, %508 : vector<16x128xf32>
    %c137 = arith.constant 137 : index
    %510 = memref.load %arg1[%c137] : memref<144xf32, #tpu.memory_space<smem>>
    %511 = vector.broadcast %510 : f32 to vector<16x128xf32>
    %512 = arith.addf %509, %511 : vector<16x128xf32>
    %cst_43 = arith.constant 5.000000e-01 : f32
    %513 = vector.broadcast %cst_43 : f32 to vector<16x128xf32>
    %514 = arith.mulf %513, %512 : vector<16x128xf32>
    %515 = math.tanh %514 : vector<16x128xf32>
    %cst_44 = arith.constant 1.000000e+00 : f32
    %516 = vector.broadcast %cst_44 : f32 to vector<16x128xf32>
    %517 = arith.addf %515, %516 : vector<16x128xf32>
    %cst_45 = arith.constant 5.000000e-01 : f32
    %518 = vector.broadcast %cst_45 : f32 to vector<16x128xf32>
    %519 = arith.mulf %518, %517 : vector<16x128xf32>
    %c4_46 = arith.constant 4 : index
    %520 = arith.index_cast %1 : i32 to index
    %c0_47 = arith.constant 0 : index
    %521 = vector.load %arg4[%c4_46, %520, %c0_47] : memref<11x16x128xf32, #tpu.memory_space<vmem>>, vector<1x16x128xf32>
    %522 = vector.shape_cast %521 : vector<1x16x128xf32> to vector<16x128xf32>
    %523 = vector.shape_cast %519 : vector<16x128xf32> to vector<1x16x128xf32>
    tpu.vector_store %arg4[%c4_46, %520, %c0_47], %523 {strides = array<i32>} : memref<11x16x128xf32, #tpu.memory_space<vmem>>, vector<1x16x128xf32>,
    %c109 = arith.constant 109 : index
    %524 = memref.load %arg1[%c109] : memref<144xf32, #tpu.memory_space<smem>>
    %525 = vector.broadcast %524 : f32 to vector<16x128xf32>
    %526 = arith.mulf %333, %525 : vector<16x128xf32>
    %c110 = arith.constant 110 : index
    %527 = memref.load %arg1[%c110] : memref<144xf32, #tpu.memory_space<smem>>
    %528 = vector.broadcast %527 : f32 to vector<16x128xf32>
    %529 = arith.mulf %348, %528 : vector<16x128xf32>
    %530 = arith.addf %526, %529 : vector<16x128xf32>
    %c111 = arith.constant 111 : index
    %531 = memref.load %arg1[%c111] : memref<144xf32, #tpu.memory_space<smem>>
    %532 = vector.broadcast %531 : f32 to vector<16x128xf32>
    %533 = arith.mulf %363, %532 : vector<16x128xf32>
    %534 = arith.addf %530, %533 : vector<16x128xf32>
    %c112 = arith.constant 112 : index
    %535 = memref.load %arg1[%c112] : memref<144xf32, #tpu.memory_space<smem>>
    %536 = vector.broadcast %535 : f32 to vector<16x128xf32>
    %537 = arith.mulf %378, %536 : vector<16x128xf32>
    %538 = arith.addf %534, %537 : vector<16x128xf32>
    %c138 = arith.constant 138 : index
    %539 = memref.load %arg1[%c138] : memref<144xf32, #tpu.memory_space<smem>>
    %540 = vector.broadcast %539 : f32 to vector<16x128xf32>
    %541 = arith.addf %538, %540 : vector<16x128xf32>
    %cst_48 = arith.constant 5.000000e-01 : f32
    %542 = vector.broadcast %cst_48 : f32 to vector<16x128xf32>
    %543 = arith.mulf %542, %541 : vector<16x128xf32>
    %544 = math.tanh %543 : vector<16x128xf32>
    %cst_49 = arith.constant 1.000000e+00 : f32
    %545 = vector.broadcast %cst_49 : f32 to vector<16x128xf32>
    %546 = arith.addf %544, %545 : vector<16x128xf32>
    %cst_50 = arith.constant 5.000000e-01 : f32
    %547 = vector.broadcast %cst_50 : f32 to vector<16x128xf32>
    %548 = arith.mulf %547, %546 : vector<16x128xf32>
    %c5_51 = arith.constant 5 : index
    %549 = arith.index_cast %1 : i32 to index
    %c0_52 = arith.constant 0 : index
    %550 = vector.load %arg4[%c5_51, %549, %c0_52] : memref<11x16x128xf32, #tpu.memory_space<vmem>>, vector<1x16x128xf32>
    %551 = vector.shape_cast %550 : vector<1x16x128xf32> to vector<16x128xf32>
    %552 = vector.shape_cast %548 : vector<16x128xf32> to vector<1x16x128xf32>
    tpu.vector_store %arg4[%c5_51, %549, %c0_52], %552 {strides = array<i32>} : memref<11x16x128xf32, #tpu.memory_space<vmem>>, vector<1x16x128xf32>,
    %c113 = arith.constant 113 : index
    %553 = memref.load %arg1[%c113] : memref<144xf32, #tpu.memory_space<smem>>
    %554 = vector.broadcast %553 : f32 to vector<16x128xf32>
    %555 = arith.mulf %333, %554 : vector<16x128xf32>
    %c114 = arith.constant 114 : index
    %556 = memref.load %arg1[%c114] : memref<144xf32, #tpu.memory_space<smem>>
    %557 = vector.broadcast %556 : f32 to vector<16x128xf32>
    %558 = arith.mulf %348, %557 : vector<16x128xf32>
    %559 = arith.addf %555, %558 : vector<16x128xf32>
    %c115 = arith.constant 115 : index
    %560 = memref.load %arg1[%c115] : memref<144xf32, #tpu.memory_space<smem>>
    %561 = vector.broadcast %560 : f32 to vector<16x128xf32>
    %562 = arith.mulf %363, %561 : vector<16x128xf32>
    %563 = arith.addf %559, %562 : vector<16x128xf32>
    %c116 = arith.constant 116 : index
    %564 = memref.load %arg1[%c116] : memref<144xf32, #tpu.memory_space<smem>>
    %565 = vector.broadcast %564 : f32 to vector<16x128xf32>
    %566 = arith.mulf %378, %565 : vector<16x128xf32>
    %567 = arith.addf %563, %566 : vector<16x128xf32>
    %c139 = arith.constant 139 : index
    %568 = memref.load %arg1[%c139] : memref<144xf32, #tpu.memory_space<smem>>
    %569 = vector.broadcast %568 : f32 to vector<16x128xf32>
    %570 = arith.addf %567, %569 : vector<16x128xf32>
    %cst_53 = arith.constant 5.000000e-01 : f32
    %571 = vector.broadcast %cst_53 : f32 to vector<16x128xf32>
    %572 = arith.mulf %571, %570 : vector<16x128xf32>
    %573 = math.tanh %572 : vector<16x128xf32>
    %cst_54 = arith.constant 1.000000e+00 : f32
    %574 = vector.broadcast %cst_54 : f32 to vector<16x128xf32>
    %575 = arith.addf %573, %574 : vector<16x128xf32>
    %cst_55 = arith.constant 5.000000e-01 : f32
    %576 = vector.broadcast %cst_55 : f32 to vector<16x128xf32>
    %577 = arith.mulf %576, %575 : vector<16x128xf32>
    %c6_56 = arith.constant 6 : index
    %578 = arith.index_cast %1 : i32 to index
    %c0_57 = arith.constant 0 : index
    %579 = vector.load %arg4[%c6_56, %578, %c0_57] : memref<11x16x128xf32, #tpu.memory_space<vmem>>, vector<1x16x128xf32>
    %580 = vector.shape_cast %579 : vector<1x16x128xf32> to vector<16x128xf32>
    %581 = vector.shape_cast %577 : vector<16x128xf32> to vector<1x16x128xf32>
    tpu.vector_store %arg4[%c6_56, %578, %c0_57], %581 {strides = array<i32>} : memref<11x16x128xf32, #tpu.memory_space<vmem>>, vector<1x16x128xf32>,
    %c117 = arith.constant 117 : index
    %582 = memref.load %arg1[%c117] : memref<144xf32, #tpu.memory_space<smem>>
    %583 = vector.broadcast %582 : f32 to vector<16x128xf32>
    %584 = arith.mulf %333, %583 : vector<16x128xf32>
    %c118 = arith.constant 118 : index
    %585 = memref.load %arg1[%c118] : memref<144xf32, #tpu.memory_space<smem>>
    %586 = vector.broadcast %585 : f32 to vector<16x128xf32>
    %587 = arith.mulf %348, %586 : vector<16x128xf32>
    %588 = arith.addf %584, %587 : vector<16x128xf32>
    %c119 = arith.constant 119 : index
    %589 = memref.load %arg1[%c119] : memref<144xf32, #tpu.memory_space<smem>>
    %590 = vector.broadcast %589 : f32 to vector<16x128xf32>
    %591 = arith.mulf %363, %590 : vector<16x128xf32>
    %592 = arith.addf %588, %591 : vector<16x128xf32>
    %c120 = arith.constant 120 : index
    %593 = memref.load %arg1[%c120] : memref<144xf32, #tpu.memory_space<smem>>
    %594 = vector.broadcast %593 : f32 to vector<16x128xf32>
    %595 = arith.mulf %378, %594 : vector<16x128xf32>
    %596 = arith.addf %592, %595 : vector<16x128xf32>
    %c140 = arith.constant 140 : index
    %597 = memref.load %arg1[%c140] : memref<144xf32, #tpu.memory_space<smem>>
    %598 = vector.broadcast %597 : f32 to vector<16x128xf32>
    %599 = arith.addf %596, %598 : vector<16x128xf32>
    %cst_58 = arith.constant 5.000000e-01 : f32
    %600 = vector.broadcast %cst_58 : f32 to vector<16x128xf32>
    %601 = arith.mulf %600, %599 : vector<16x128xf32>
    %602 = math.tanh %601 : vector<16x128xf32>
    %cst_59 = arith.constant 1.000000e+00 : f32
    %603 = vector.broadcast %cst_59 : f32 to vector<16x128xf32>
    %604 = arith.addf %602, %603 : vector<16x128xf32>
    %cst_60 = arith.constant 5.000000e-01 : f32
    %605 = vector.broadcast %cst_60 : f32 to vector<16x128xf32>
    %606 = arith.mulf %605, %604 : vector<16x128xf32>
    %c7_61 = arith.constant 7 : index
    %607 = arith.index_cast %1 : i32 to index
    %c0_62 = arith.constant 0 : index
    %608 = vector.load %arg4[%c7_61, %607, %c0_62] : memref<11x16x128xf32, #tpu.memory_space<vmem>>, vector<1x16x128xf32>
    %609 = vector.shape_cast %608 : vector<1x16x128xf32> to vector<16x128xf32>
    %610 = vector.shape_cast %606 : vector<16x128xf32> to vector<1x16x128xf32>
    tpu.vector_store %arg4[%c7_61, %607, %c0_62], %610 {strides = array<i32>} : memref<11x16x128xf32, #tpu.memory_space<vmem>>, vector<1x16x128xf32>,
    %c121 = arith.constant 121 : index
    %611 = memref.load %arg1[%c121] : memref<144xf32, #tpu.memory_space<smem>>
    %612 = vector.broadcast %611 : f32 to vector<16x128xf32>
    %613 = arith.mulf %333, %612 : vector<16x128xf32>
    %c122 = arith.constant 122 : index
    %614 = memref.load %arg1[%c122] : memref<144xf32, #tpu.memory_space<smem>>
    %615 = vector.broadcast %614 : f32 to vector<16x128xf32>
    %616 = arith.mulf %348, %615 : vector<16x128xf32>
    %617 = arith.addf %613, %616 : vector<16x128xf32>
    %c123 = arith.constant 123 : index
    %618 = memref.load %arg1[%c123] : memref<144xf32, #tpu.memory_space<smem>>
    %619 = vector.broadcast %618 : f32 to vector<16x128xf32>
    %620 = arith.mulf %363, %619 : vector<16x128xf32>
    %621 = arith.addf %617, %620 : vector<16x128xf32>
    %c124 = arith.constant 124 : index
    %622 = memref.load %arg1[%c124] : memref<144xf32, #tpu.memory_space<smem>>
    %623 = vector.broadcast %622 : f32 to vector<16x128xf32>
    %624 = arith.mulf %378, %623 : vector<16x128xf32>
    %625 = arith.addf %621, %624 : vector<16x128xf32>
    %c141 = arith.constant 141 : index
    %626 = memref.load %arg1[%c141] : memref<144xf32, #tpu.memory_space<smem>>
    %627 = vector.broadcast %626 : f32 to vector<16x128xf32>
    %628 = arith.addf %625, %627 : vector<16x128xf32>
    %cst_63 = arith.constant 5.000000e-01 : f32
    %629 = vector.broadcast %cst_63 : f32 to vector<16x128xf32>
    %630 = arith.mulf %629, %628 : vector<16x128xf32>
    %631 = math.tanh %630 : vector<16x128xf32>
    %cst_64 = arith.constant 1.000000e+00 : f32
    %632 = vector.broadcast %cst_64 : f32 to vector<16x128xf32>
    %633 = arith.addf %631, %632 : vector<16x128xf32>
    %cst_65 = arith.constant 5.000000e-01 : f32
    %634 = vector.broadcast %cst_65 : f32 to vector<16x128xf32>
    %635 = arith.mulf %634, %633 : vector<16x128xf32>
    %c8_66 = arith.constant 8 : index
    %636 = arith.index_cast %1 : i32 to index
    %c0_67 = arith.constant 0 : index
    %637 = vector.load %arg4[%c8_66, %636, %c0_67] : memref<11x16x128xf32, #tpu.memory_space<vmem>>, vector<1x16x128xf32>
    %638 = vector.shape_cast %637 : vector<1x16x128xf32> to vector<16x128xf32>
    %639 = vector.shape_cast %635 : vector<16x128xf32> to vector<1x16x128xf32>
    tpu.vector_store %arg4[%c8_66, %636, %c0_67], %639 {strides = array<i32>} : memref<11x16x128xf32, #tpu.memory_space<vmem>>, vector<1x16x128xf32>,
    %c125 = arith.constant 125 : index
    %640 = memref.load %arg1[%c125] : memref<144xf32, #tpu.memory_space<smem>>
    %641 = vector.broadcast %640 : f32 to vector<16x128xf32>
    %642 = arith.mulf %333, %641 : vector<16x128xf32>
    %c126 = arith.constant 126 : index
    %643 = memref.load %arg1[%c126] : memref<144xf32, #tpu.memory_space<smem>>
    %644 = vector.broadcast %643 : f32 to vector<16x128xf32>
    %645 = arith.mulf %348, %644 : vector<16x128xf32>
    %646 = arith.addf %642, %645 : vector<16x128xf32>
    %c127 = arith.constant 127 : index
    %647 = memref.load %arg1[%c127] : memref<144xf32, #tpu.memory_space<smem>>
    %648 = vector.broadcast %647 : f32 to vector<16x128xf32>
    %649 = arith.mulf %363, %648 : vector<16x128xf32>
    %650 = arith.addf %646, %649 : vector<16x128xf32>
    %c128 = arith.constant 128 : index
    %651 = memref.load %arg1[%c128] : memref<144xf32, #tpu.memory_space<smem>>
    %652 = vector.broadcast %651 : f32 to vector<16x128xf32>
    %653 = arith.mulf %378, %652 : vector<16x128xf32>
    %654 = arith.addf %650, %653 : vector<16x128xf32>
    %c142 = arith.constant 142 : index
    %655 = memref.load %arg1[%c142] : memref<144xf32, #tpu.memory_space<smem>>
    %656 = vector.broadcast %655 : f32 to vector<16x128xf32>
    %657 = arith.addf %654, %656 : vector<16x128xf32>
    %cst_68 = arith.constant 5.000000e-01 : f32
    %658 = vector.broadcast %cst_68 : f32 to vector<16x128xf32>
    %659 = arith.mulf %658, %657 : vector<16x128xf32>
    %660 = math.tanh %659 : vector<16x128xf32>
    %cst_69 = arith.constant 1.000000e+00 : f32
    %661 = vector.broadcast %cst_69 : f32 to vector<16x128xf32>
    %662 = arith.addf %660, %661 : vector<16x128xf32>
    %cst_70 = arith.constant 5.000000e-01 : f32
    %663 = vector.broadcast %cst_70 : f32 to vector<16x128xf32>
    %664 = arith.mulf %663, %662 : vector<16x128xf32>
    %c9_71 = arith.constant 9 : index
    %665 = arith.index_cast %1 : i32 to index
    %c0_72 = arith.constant 0 : index
    %666 = vector.load %arg4[%c9_71, %665, %c0_72] : memref<11x16x128xf32, #tpu.memory_space<vmem>>, vector<1x16x128xf32>
    %667 = vector.shape_cast %666 : vector<1x16x128xf32> to vector<16x128xf32>
    %668 = vector.shape_cast %664 : vector<16x128xf32> to vector<1x16x128xf32>
    tpu.vector_store %arg4[%c9_71, %665, %c0_72], %668 {strides = array<i32>} : memref<11x16x128xf32, #tpu.memory_space<vmem>>, vector<1x16x128xf32>,
    %c129 = arith.constant 129 : index
    %669 = memref.load %arg1[%c129] : memref<144xf32, #tpu.memory_space<smem>>
    %670 = vector.broadcast %669 : f32 to vector<16x128xf32>
    %671 = arith.mulf %333, %670 : vector<16x128xf32>
    %c130 = arith.constant 130 : index
    %672 = memref.load %arg1[%c130] : memref<144xf32, #tpu.memory_space<smem>>
    %673 = vector.broadcast %672 : f32 to vector<16x128xf32>
    %674 = arith.mulf %348, %673 : vector<16x128xf32>
    %675 = arith.addf %671, %674 : vector<16x128xf32>
    %c131 = arith.constant 131 : index
    %676 = memref.load %arg1[%c131] : memref<144xf32, #tpu.memory_space<smem>>
    %677 = vector.broadcast %676 : f32 to vector<16x128xf32>
    %678 = arith.mulf %363, %677 : vector<16x128xf32>
    %679 = arith.addf %675, %678 : vector<16x128xf32>
    %c132 = arith.constant 132 : index
    %680 = memref.load %arg1[%c132] : memref<144xf32, #tpu.memory_space<smem>>
    %681 = vector.broadcast %680 : f32 to vector<16x128xf32>
    %682 = arith.mulf %378, %681 : vector<16x128xf32>
    %683 = arith.addf %679, %682 : vector<16x128xf32>
    %c143 = arith.constant 143 : index
    %684 = memref.load %arg1[%c143] : memref<144xf32, #tpu.memory_space<smem>>
    %685 = vector.broadcast %684 : f32 to vector<16x128xf32>
    %686 = arith.addf %683, %685 : vector<16x128xf32>
    %cst_73 = arith.constant 5.000000e-01 : f32
    %687 = vector.broadcast %cst_73 : f32 to vector<16x128xf32>
    %688 = arith.mulf %687, %686 : vector<16x128xf32>
    %689 = math.tanh %688 : vector<16x128xf32>
    %cst_74 = arith.constant 1.000000e+00 : f32
    %690 = vector.broadcast %cst_74 : f32 to vector<16x128xf32>
    %691 = arith.addf %689, %690 : vector<16x128xf32>
    %cst_75 = arith.constant 5.000000e-01 : f32
    %692 = vector.broadcast %cst_75 : f32 to vector<16x128xf32>
    %693 = arith.mulf %692, %691 : vector<16x128xf32>
    %c10_76 = arith.constant 10 : index
    %694 = arith.index_cast %1 : i32 to index
    %c0_77 = arith.constant 0 : index
    %695 = vector.load %arg4[%c10_76, %694, %c0_77] : memref<11x16x128xf32, #tpu.memory_space<vmem>>, vector<1x16x128xf32>
    %696 = vector.shape_cast %695 : vector<1x16x128xf32> to vector<16x128xf32>
    %697 = vector.shape_cast %693 : vector<16x128xf32> to vector<1x16x128xf32>
    tpu.vector_store %arg4[%c10_76, %694, %c0_77], %697 {strides = array<i32>} : memref<11x16x128xf32, #tpu.memory_space<vmem>>, vector<1x16x128xf32>,
    %c1_i32 = arith.constant 1 : i32
    return
  }
  func.func @transform_0(%arg0: i32) -> i32 {
    %c0_i32 = arith.constant 0 : i32
    %c0_i32_0 = arith.constant 0 : i32
    return %c0_i32 : i32
  }
  func.func @transform_1(%arg0: i32) -> (i32, i32, i32) {
    %c0_i32 = arith.constant 0 : i32
    %c0_i32_0 = arith.constant 0 : i32
    %c0_i32_1 = arith.constant 0 : i32
    return %c0_i32, %arg0, %c0_i32_0 : i32, i32, i32
  }
  func.func @transform_2(%arg0: i32) -> (i32, i32, i32) {
    %c0_i32 = arith.constant 0 : i32
    %c0_i32_0 = arith.constant 0 : i32
    %c0_i32_1 = arith.constant 0 : i32
    return %c0_i32, %arg0, %c0_i32_0 : i32, i32, i32
  }
  func.func @transform_3(%arg0: i32) -> (i32, i32, i32) {
    %c0_i32 = arith.constant 0 : i32
    %c0_i32_0 = arith.constant 0 : i32
    %c0_i32_1 = arith.constant 0 : i32
    return %c0_i32, %arg0, %c0_i32_0 : i32, i32, i32
  }
}

</mosaic_0001>

<bundles_post_ra>
// kernel: autoencoder_forward.1
= control target key start
LH: loop header
LB: loop body
LE: loop exit
PB: predicated region body
PF: predicated region fallthrough
CT: control target
= control target key end

     0   :  { %s2655_s0 = inlined_call_operand.vmem [shape: f32[144], index: 0, kind: input, shape index: {}]   ;;  %s2656_s1 = inlined_call_operand.vmem [shape: f32[11,16,128], index: 1, kind: input, shape index: {}]   ;;  %s2657_s2 = inlined_call_operand.vmem [shape: f32[1,16,128], index: 2, kind: output, shape index: {0}]   ;;  %s2658_s3 = inlined_call_operand.vmem [shape: f32[11,16,128], index: 3, kind: output, shape index: {1}]  }
   0x1   :  { %2773 = sst [smem:[#allocation70_spill]] %s2657_s2 }
   0x2   :  { %2774 = sst [smem:[#allocation71_spill]] %s2658_s3 }
   0x3   :  { %9 = vsyncpa [#allocation3], 0  ;;  %s16_s14 = sshll.u32 %s2655_s0, 4  ;;  %s17_s14 = int_to_ptr.vmem [resolvable:$true] %s16_s14 }
   0x4   :  { %s1291_s15 = scalar_lea.vmem %s17_s14, 32  ;;  %p1296_p1 = scmp.lt.s32.totalorder %s17_s14, %s17_s14 }
   0x5   :  { %p1292_p0 = scmp.ne.s32.totalorder %s17_s14, %s1291_s15  ;;  %p1297_p2 = scmp.lt.s32.totalorder %s1291_s15, %s1291_s15 }
   0x7   :  { %p1298_p3 = por %p1297_p2, %p1296_p1 }
   0x9   :  { %p1299_p4 = pnand %p1298_p3, %p1292_p0 }
   0xb   :  { %1302 = shalt.err (!%p1299_p4)
}
   0xc   :  { %s1305_s16 = smov [#allocation2]  }
   0xd   :  { %19 = dma.vmem_to_smem %s17_s14, 32, %s1305_s16, [#allocation3]  }
   0xe   :  { %1303 = dma.done.wait [#allocation3], 32  }
   0xf   :  { %1304 = vsyncadd [#allocation3], 4294967264 }
  0x10   :  { %25 = sfence }
  0x11   :  { %s68_s17 = sld [smem:[#allocation2]]  ;;  %v1334_v0 = vld [vmem:[%s2656_s1] sm:$0xff]  ;;  %v1341_v1 = vld [vmem:[%s2656_s1 + $0x8] sm:$0xff]  ;;  %v1346_v2 = vld [vmem:[%s2656_s1 + $0x10] sm:$0xff] }
  0x12   :  { %s1027_s18 = sld [smem:[#allocation2 + $0x1]]  ;;  %v1353_v3 = vld [vmem:[%s2656_s1 + $0x18] sm:$0xff]  ;;  %v1358_v4 = vld [vmem:[%s2656_s1 + $0x20] sm:$0xff]  ;;  %v1365_v6 = vld [vmem:[%s2656_s1 + $0x28] sm:$0xff] }
  0x13   :  { %s1028_s19 = sld [smem:[#allocation2 + $0x2]]  ;;  %v1370_v7 = vld [vmem:[%s2656_s1 + $0x30] sm:$0xff]  ;;  %v1383_v14 = vld [vmem:[%s2656_s1 + $0x40] sm:$0xff]  ;;  %v1392_v17 = vld [vmem:[%s2656_s1 + $0x38] sm:$0xff] }
  0x14   :  { %s1329_s20 = sld [smem:[#allocation2 + $0x3]]  ;;  %v1402_v23 = vld [vmem:[%s2656_s1 + $0x50] sm:$0xff]  ;;  %v1412_v29 = vld [vmem:[%s2656_s1 + $0x60] sm:$0xff]  ;;  %v1420_v31 = vld [vmem:[%s2656_s1 + $0x48] sm:$0xff] }
  0x15   :  { %s1336_s22 = sld [smem:[#allocation2 + $0x4]]  ;;  %v1428_v34 = vld [vmem:[%s2656_s1 + $0x70] sm:$0xff]  ;;  %v1436_v36 = vld [vmem:[%s2656_s1 + $0x58] sm:$0xff]  ;;  %v1459_v49 = vld [vmem:[%s2656_s1 + $0x80] sm:$0xff] }
  0x16   :  { %s1348_s27 = sld [smem:[#allocation2 + $0x5]]  ;;  %v1478_v61 = vld [vmem:[%s2656_s1 + $0x68] sm:$0xff] }
  0x17   :  { %v69_v5 = vstv %s68_s17  ;;  %s1360_s5 = sld [smem:[#allocation2 + $0x6]] }
  0x18   :  { %v70_v8 = vmul.f32 %v69_v5, %v1334_v0  ;;  %v73_v9 = vstv %s1027_s18  ;;  %s1373_s10 = sld [smem:[#allocation2 + $0x7]]  ;;  %v71_v10 = vmul.f32 %v69_v5, %v1341_v1 }
  0x19   :  { %v74_v11 = vmul.f32 %v1346_v2, %v73_v9  ;;  %v79_v12 = vstv %s1028_s19  ;;  %s1377_s11 = sld [smem:[#allocation2 + $0x8]]  ;;  %v75_v13 = vmul.f32 %v1353_v3, %v73_v9  ;;  %v1487_v9 = vld [vmem:[%s2656_s1 + $0x90] sm:$0xff] }
  0x1a   :  { %v80_v15 = vmul.f32 %v1358_v4, %v79_v12  ;;  %v85_v16 = vstv %s1329_s20  ;;  %s1387_s14 = sld [smem:[#allocation2 + $0x9]]  ;;  %v81_v18 = vmul.f32 %v1365_v6, %v79_v12 }
  0x1b   :  { %v76_v19 = vadd.f32 %v74_v11, %v70_v8  ;;  %v86_v20 = vmul.f32 %v1370_v7, %v85_v16  ;;  %v91_v21 = vstv %s1336_s22  ;;  %s1397_s17 = sld [smem:[#allocation2 + $0xa]]  ;;  %v77_v22 = vadd.f32 %v75_v13, %v71_v10 }
  0x1c   :  { %v97_v24 = vstv %s1348_s27  ;;  %s1405_s20 = sld [smem:[#allocation2 + $0x2c]]  ;;  %v92_v26 = vmul.f32 %v1383_v14, %v91_v21  ;;  %v87_v28 = vmul.f32 %v1392_v17, %v85_v16  ;;  %v93_v40 = vmul.f32 %v1420_v31, %v91_v21 }
  0x1d   :  { %v82_v25 = vadd.f32 %v80_v15, %v76_v19  ;;  %s1038_s21 = sld [smem:[#allocation2 + $0xb]]  ;;  %v83_v27 = vadd.f32 %v81_v18, %v77_v22  ;;  %v103_v30 = vstv %s1360_s5  ;;  %v98_v33 = vmul.f32 %v1402_v23, %v97_v24  ;;  %v1499_v15 = vld [vmem:[%s2656_s1 + $0x78] sm:$0xff] }
  0x1e   :  { %s1415_s23 = sld [smem:[#allocation2 + $0xc]]  ;;  %v109_v35 = vstv %s1373_s10  ;;  %v104_v38 = vmul.f32 %v1412_v29, %v103_v30  ;;  %v99_v44 = vmul.f32 %v1436_v36, %v97_v24  ;;  %v105_v18 = vmul.f32 %v1478_v61, %v103_v30 }
  0x1f   :  { %v88_v32 = vadd.f32 %v86_v20, %v82_v25  ;;  %s1423_s26 = sld [smem:[#allocation2 + $0xd]]  ;;  %v89_v39 = vadd.f32 %v87_v28, %v83_v27  ;;  %v110_v42 = vmul.f32 %v1428_v34, %v109_v35  ;;  %v115_v45 = vstv %s1377_s11  ;;  %v1505_v20 = vld [vmem:[%s2656_s1 + $0xa0] sm:$0xff]  ;;  %v1514_v25 = vld [vmem:[%s2656_s1 + $0x88] sm:$0xff] }
  0x20   :  { %s1431_s29 = sld [smem:[#allocation2 + $0xe]]  ;;  %v116_v63 = vmul.f32 %v1459_v49, %v115_v45  ;;  %v121_v10 = vstv %s1387_s14 }
  0x21   :  { %v94_v37 = vadd.f32 %v92_v26, %v88_v32  ;;  %s1439_s5 = sld [smem:[#allocation2 + $0xf]]  ;;  %v95_v53 = vadd.f32 %v93_v40, %v89_v39  ;;  %v127_v21 = vstv %s1397_s17  ;;  %v122_v27 = vmul.f32 %v1487_v9, %v121_v10 }
  0x22   :  { %s1442_s6 = sld [smem:[#allocation2 + $0x10]]  ;;  %v128_v39 = vmul.f32 %v1505_v20, %v127_v21 }
  0x23   :  { %v100_v41 = vadd.f32 %v98_v33, %v94_v37  ;;  %v139_v43 = vstv %s1038_s21  ;;  %s1447_s7 = sld [smem:[#allocation2 + $0x11]]  ;;  %v101_v16 = vadd.f32 %v99_v44, %v95_v53 }
  0x24   :  { %v140_v46 = vmul.f32 %v139_v43, %v1334_v0  ;;  %v143_v47 = vstv %s1415_s23  ;;  %s1453_s8 = sld [smem:[#allocation2 + $0x12]]  ;;  %v141_v48 = vmul.f32 %v139_v43, %v1341_v1 }
  0x25   :  { %v106_v50 = vadd.f32 %v104_v38, %v100_v41  ;;  %v144_v51 = vmul.f32 %v1346_v2, %v143_v47  ;;  %v149_v52 = vstv %s1423_s26  ;;  %s1463_s13 = sld [smem:[#allocation2 + $0x13]]  ;;  %v145_v56 = vmul.f32 %v1353_v3, %v143_v47 }
  0x26   :  { %v150_v54 = vmul.f32 %v1358_v4, %v149_v52  ;;  %v155_v55 = vstv %s1431_s29  ;;  %s1467_s11 = sld [smem:[#allocation2 + $0x14]]  ;;  %v151_v57 = vmul.f32 %v1365_v6, %v149_v52  ;;  %v111_v38 = vmul.f32 %v1499_v15, %v109_v35 }
  0x27   :  { %v146_v58 = vadd.f32 %v144_v51, %v140_v46  ;;  %v156_v59 = vmul.f32 %v1370_v7, %v155_v55  ;;  %v161_v60 = vstv %s1439_s5  ;;  %s1473_s15 = sld [smem:[#allocation2 + $0x15]]  ;;  %v112_v62 = vadd.f32 %v110_v42, %v106_v50 }
  0x28   :  { %v167_v5 = vstv %s1442_s6  ;;  %s1482_s19 = sld [smem:[#allocation2 + $0x2d]]  ;;  %v147_v8 = vadd.f32 %v145_v56, %v141_v48  ;;  %v162_v12 = vmul.f32 %v1383_v14, %v161_v60  ;;  %v157_v30 = vmul.f32 %v1392_v17, %v155_v55 }
  0x29   :  { %v152_v11 = vadd.f32 %v150_v54, %v146_v58  ;;  %s1491_s22 = sld [smem:[#allocation2 + $0x16]]  ;;  %v173_v13 = vstv %s1447_s7  ;;  %v168_v24 = vmul.f32 %v1402_v23, %v167_v5  ;;  %v118_v26 = vadd.f32 %v116_v63, %v112_v62 }
  0x2a   :  { %s1494_s23 = sld [smem:[#allocation2 + $0x17]]  ;;  %v153_v19 = vadd.f32 %v151_v57, %v147_v8  ;;  %v179_v28 = vstv %s1453_s8  ;;  %v174_v33 = vmul.f32 %v1412_v29, %v173_v13  ;;  %v107_v40 = vadd.f32 %v105_v18, %v101_v16  ;;  %v1589_v16 = vld [vmem:[%s2656_s1 + $0xa8] sm:$0xff] }
  0x2b   :  { %v158_v22 = vadd.f32 %v156_v59, %v152_v11  ;;  %s1509_s28 = sld [smem:[#allocation2 + $0x18]]  ;;  %v185_v37 = vstv %s1463_s13  ;;  %v117_v41 = vmul.f32 %v1514_v25, %v115_v45  ;;  %v180_v44 = vmul.f32 %v1428_v34, %v179_v28 }
  0x2c   :  { %s1520_s4 = sld [smem:[#allocation2 + $0x19]]  ;;  %v159_v42 = vadd.f32 %v157_v30, %v153_v19  ;;  %v163_v35 = vmul.f32 %v1420_v31, %v161_v60  ;;  %v124_v47 = vadd.f32 %v122_v27, %v118_v26  ;;  %v186_v48 = vmul.f32 %v1459_v49, %v185_v37 }
  0x2d   :  { %v164_v32 = vadd.f32 %v162_v12, %v158_v22  ;;  %s1527_s5 = sld [smem:[#allocation2 + $0x1a]]  ;;  %v191_v52 = vstv %s1467_s11  ;;  %v169_v58 = vmul.f32 %v1436_v36, %v167_v5  ;;  %v133_v8 = vstv %s1405_s20  ;;  %v1584_v5 = vld [vmem:[%s2656_s1 + $0x98] sm:$0xff] }
  0x2e   :  { %s1535_s6 = sld [smem:[#allocation2 + $0x1b]]  ;;  %v165_v57 = vadd.f32 %v163_v35, %v159_v42  ;;  %v192_v11 = vmul.f32 %v1487_v9, %v191_v52  ;;  %v113_v18 = vadd.f32 %v111_v38, %v107_v40  ;;  %v197_v22 = vstv %s1473_s15 }
  0x2f   :  { %v170_v43 = vadd.f32 %v168_v24, %v164_v32  ;;  %v209_v46 = vstv %s1491_s22  ;;  %s1542_s10 = sld [smem:[#allocation2 + $0x1c]]  ;;  %v130_v27 = vadd.f32 %v128_v39, %v124_v47  ;;  %v123_v42 = vmul.f32 %v1584_v5, %v121_v10 }
  0x30   :  { %v210_v45 = vmul.f32 %v209_v46, %v1334_v0  ;;  %v213_v50 = vstv %s1494_s23  ;;  %s1552_s9 = sld [smem:[#allocation2 + $0x1d]]  ;;  %v171_v32 = vadd.f32 %v169_v58, %v165_v57  ;;  %v1614_v39 = vmul.f32 %v1589_v16, %v127_v21 }
  0x31   :  { %v176_v51 = vadd.f32 %v174_v33, %v170_v43  ;;  %v214_v53 = vmul.f32 %v1346_v2, %v213_v50  ;;  %v219_v54 = vstv %s1509_s28  ;;  %s1559_s12 = sld [smem:[#allocation2 + $0x1e]]  ;;  %v175_v33 = vmul.f32 %v1478_v61, %v173_v13 }
  0x32   :  { %v220_v55 = vmul.f32 %v1358_v4, %v219_v54  ;;  %v225_v56 = vstv %s1520_s4  ;;  %s1565_s16 = sld [smem:[#allocation2 + $0x1f]]  ;;  %v198_v13 = vmul.f32 %v1505_v20, %v197_v22  ;;  %v203_v47 = vstv %s1482_s19 }
  0x33   :  { %v182_v59 = vadd.f32 %v180_v44, %v176_v51  ;;  %v216_v60 = vadd.f32 %v214_v53, %v210_v45  ;;  %v226_v62 = vmul.f32 %v1370_v7, %v225_v56  ;;  %v231_v63 = vstv %s1527_s5  ;;  %s1572_s18 = sld [smem:[#allocation2 + $0x20]] }
  0x34   :  { %v237_v12 = vstv %s1535_s6  ;;  %s1579_s21 = sld [smem:[#allocation2 + $0x2e]]  ;;  %v232_v26 = vmul.f32 %v1383_v14, %v231_v63  ;;  %v119_v21 = vadd.f32 %v117_v41, %v113_v18  ;;  %v134_v45 = vadd.f32 %v133_v8, %v130_v27 }
  0x35   :  { %v188_v19 = vadd.f32 %v186_v48, %v182_v59  ;;  %v222_v24 = vadd.f32 %v220_v55, %v216_v60  ;;  %s1595_s27 = sld [smem:[#allocation2 + $0x21]]  ;;  %v243_v30 = vstv %s1542_s10  ;;  %v238_v40 = vmul.f32 %v1402_v23, %v237_v12 }
  0x36   :  { %s1598_s29 = sld [smem:[#allocation2 + $0x22]]  ;;  %v249_v44 = vstv %s1552_s9  ;;  %v244_v10 = vmul.f32 %v1412_v29, %v243_v30  ;;  %v177_v53 = vadd.f32 %v175_v33, %v171_v32  ;;  %v181_v55 = vmul.f32 %v1499_v15, %v179_v28 }
  0x37   :  { %v228_v38 = vadd.f32 %v226_v62, %v222_v24  ;;  %s1606_s1 = sld [smem:[#allocation2 + $0x23]]  ;;  %v194_v43 = vadd.f32 %v192_v11, %v188_v19  ;;  %v255_v35 = vstv %s1559_s12  ;;  %v250_v58 = vmul.f32 %v1428_v34, %v249_v44 }
  0x38   :  { %s1621_s7 = sld [smem:[#allocation2 + $0x24]]  ;;  %v261_v51 = vstv %s1565_s16  ;;  %v256_v41 = vmul.f32 %v1459_v49, %v255_v35  ;;  %v211_v11 = vmul.f32 %v209_v46, %v1341_v1  ;;  %v215_v46 = vmul.f32 %v1353_v3, %v213_v50 }
  0x39   :  { %v234_v48 = vadd.f32 %v232_v26, %v228_v38  ;;  %s1627_s14 = sld [smem:[#allocation2 + $0x25]]  ;;  %v200_v60 = vadd.f32 %v198_v13, %v194_v43  ;;  %v262_v19 = vmul.f32 %v1487_v9, %v261_v51  ;;  %v187_v13 = vmul.f32 %v1514_v25, %v185_v37 }
  0x3a   :  { %s1632_s17 = sld [smem:[#allocation2 + $0x26]]  ;;  %v217_v50 = vadd.f32 %v215_v46, %v211_v11  ;;  %1191 = vtanh.f32 %v134_v45  ;;  %v125_v37 = vadd.f32 %v123_v42, %v119_v21  ;;  %v273_v45 = vstv %s1579_s21 }
  0x3b   :  { %v240_v57 = vadd.f32 %v238_v40, %v234_v48  ;;  %v279_v59 = vstv %s1595_s27  ;;  %s1644_s30 = sld [smem:[#allocation2 + $0x27]] }
  0x3c   :  { %v280_v62 = vmul.f32 %v279_v59, %v1334_v0  ;;  %v283_v28 = vstv %s1598_s29  ;;  %s1650_s8 = sld [smem:[#allocation2 + $0x28]]  ;;  %v267_v0 = vstv %s1572_s18 }
  0x3d   :  { %v246_v18 = vadd.f32 %v244_v10, %v240_v57  ;;  %v284_v24 = vmul.f32 %v1346_v2, %v283_v28  ;;  %v289_v26 = vstv %s1606_s1  ;;  %s1662_s0 = sld [smem:[#allocation2 + $0x29]] }
  0x3e   :  { %v290_v27 = vmul.f32 %v1358_v4, %v289_v26  ;;  %v295_v32 = vstv %s1621_s7  ;;  %s1669_s22 = sld [smem:[#allocation2 + $0x2a]]  ;;  %v183_v4 = vadd.f32 %v181_v55, %v177_v53  ;;  %v221_v55 = vmul.f32 %v1365_v6, %v219_v54 }
  0x3f   :  { %v252_v33 = vadd.f32 %v250_v58, %v246_v18  ;;  %v286_v38 = vadd.f32 %v284_v24, %v280_v62  ;;  %v296_v2 = vmul.f32 %v1370_v7, %v295_v32  ;;  %v301_v40 = vstv %s1627_s14  ;;  %s1678_s24 = sld [smem:[#allocation2 + $0x2b]] }
  0x40   :  { %v307_v43 = vstv %s1632_s17  ;;  %s1681_s25 = sld [smem:[#allocation2 + $0x2f]]  ;;  %v268_v7 = vmul.f32 %v1505_v20, %v267_v0  ;;  %v302_v57 = vmul.f32 %v1383_v14, %v301_v40  ;;  %v204_v58 = vadd.f32 %v203_v47, %v200_v60 }
  0x41   :  { %v258_v48 = vadd.f32 %v256_v41, %v252_v33  ;;  %v292_v10 = vadd.f32 %v290_v27, %v286_v38  ;;  %s1692_s23 = sld [smem:[#allocation2 + $0x30]]  ;;  %v313_v53 = vstv %s1644_s30  ;;  %v308_v14 = vmul.f32 %v1402_v23, %v307_v43 }
  0x42   :  { %s1695_s13 = sld [smem:[#allocation2 + $0x31]]  ;;  %v319_v11 = vstv %s1650_s8  ;;  %v223_v42 = vadd.f32 %v221_v55, %v217_v50  ;;  %v227_v54 = vmul.f32 %v1392_v17, %v225_v56  ;;  %v314_v18 = vmul.f32 %v1412_v29, %v313_v53 }
  0x43   :  { %v264_v41 = vadd.f32 %v262_v19, %v258_v48  ;;  %v298_v62 = vadd.f32 %v296_v2, %v292_v10  ;;  %s1705_s26 = sld [smem:[#allocation2 + $0x32]]  ;;  %v189_v23 = vadd.f32 %v187_v13, %v183_v4  ;;  %v325_v19 = vstv %s1662_s0 }
  0x44   :  { %s1709_s3 = sld [smem:[#allocation2 + $0x33]]  ;;  %v193_v24 = vmul.f32 %v1584_v5, %v191_v52  ;;  %v229_v56 = vadd.f32 %v227_v54, %v223_v42  ;;  %v233_v27 = vmul.f32 %v1420_v31, %v231_v63  ;;  %1193 = vtanh.f32 %v204_v58 }
  0x45   :  { %v270_v21 = vadd.f32 %v268_v7, %v264_v41  ;;  %v304_v60 = vadd.f32 %v302_v57, %v298_v62  ;;  %s1717_s28 = sld [smem:[#allocation2 + $0x3c]]  ;;  %v320_v29 = vmul.f32 %v1428_v34, %v319_v11  ;;  %v239_v33 = vmul.f32 %v1436_v36, %v237_v12 }
  0x46   :  { %s1720_s2 = sld [smem:[#allocation2 + $0x34]]  ;;  %v331_v38 = vstv %s1669_s22  ;;  %v235_v52 = vadd.f32 %v233_v27, %v229_v56  ;;  %v245_v63 = vmul.f32 %v1478_v61, %v243_v30  ;;  %v326_v34 = vmul.f32 %v1459_v49, %v325_v19 }
  0x47   :  { %v310_v46 = vadd.f32 %v308_v14, %v304_v60  ;;  %s1731_s4 = sld [smem:[#allocation2 + $0x35]]  ;;  %v274_v2 = vadd.f32 %v273_v45, %v270_v21  ;;  %v337_v12 = vstv %s1678_s24  ;;  %v131_v13 = vadd.f32 %v1614_v39, %v125_v37 }
  0x48   :  { %s1737_s11 = sld [smem:[#allocation2 + $0x36]]  ;;  %v241_v50 = vadd.f32 %v239_v33, %v235_v52  ;;  %v251_v30 = vmul.f32 %v1499_v15, %v249_v44  ;;  %v332_v7 = vmul.f32 %v1487_v9, %v331_v38  ;;  %v195_v49 = vadd.f32 %v193_v24, %v189_v23 }
  0x49   :  { %v316_v4 = vadd.f32 %v314_v18, %v310_v46  ;;  %s1747_s5 = sld [smem:[#allocation2 + $0x37]]  ;;  %v199_v10 = vmul.f32 %v1589_v16, %v197_v22  ;;  %v257_v39 = vmul.f32 %v1514_v25, %v255_v35  ;;  %v281_v44 = vmul.f32 %v279_v59, %v1341_v1  ;;  %v1192_v59 = vpop.eup %1191 }
  0x4a   :  { %s1750_s6 = sld [smem:[#allocation2 + $0x3d]]  ;;  %v247_v57 = vadd.f32 %v245_v63, %v241_v50  ;;  %v285_v9 = vmul.f32 %v1353_v3, %v283_v28  ;;  %1195 = vtanh.f32 %v274_v2  ;;  %v338_v22 = vmul.f32 %v1505_v20, %v337_v12 }
  0x4b   :  { %2775 = sst [smem:[#allocation5_spill]] %s1717_s28  ;;  %v322_v48 = vadd.f32 %v320_v29, %v316_v4  ;;  %v263_v35 = vmul.f32 %v1584_v5, %v261_v51  ;;  %v201_v3 = vadd.f32 %v199_v10, %v195_v49  ;;  %v291_v20 = vmul.f32 %v1365_v6, %v289_v26 }
  0x4c   :  { %s1759_s10 = sld [smem:[#allocation2 + $0x38]]  ;;  %v253_v55 = vadd.f32 %v251_v30, %v247_v57  ;;  %v287_v1 = vadd.f32 %v285_v9, %v281_v44  ;;  %v297_v28 = vmul.f32 %v1392_v17, %v295_v32  ;;  %v343_v41 = vstv %s1681_s25 }
  0x4d   :  { %s1764_s28 = sld [smem:[#allocation2 + $0x39]]  ;;  %v328_v37 = vadd.f32 %v326_v34, %v322_v48  ;;  %v135_v51 = vadd.f32 %v133_v8, %v131_v13  ;;  %v303_v6 = vmul.f32 %v1420_v31, %v301_v40  ;;  %v269_v26 = vmul.f32 %v1589_v16, %v267_v0 }
  0x4e   :  { %s1778_s15 = sld [smem:[#allocation2 + $0x3a]]  ;;  %v259_v62 = vadd.f32 %v257_v39, %v253_v55  ;;  %v293_v42 = vadd.f32 %v291_v20, %v287_v1  ;;  %v205_v32 = vadd.f32 %v203_v47, %v201_v3  ;;  %v349_v31 = vstv %s1692_s23 }
  0x4f   :  { %s1780_s9 = sld [smem:[#allocation2 + $0x3b]]  ;;  %v334_v58 = vadd.f32 %v332_v7, %v328_v37  ;;  %v353_v40 = vstv %s1695_s13  ;;  %1197 = vtanh.f32 %v135_v51  ;;  %v309_v0 = vmul.f32 %v1436_v36, %v307_v43 }
  0x50   :  { %s1785_s12 = sld [smem:[#allocation2 + $0x3e]]  ;;  %v265_v17 = vadd.f32 %v263_v35, %v259_v62  ;;  %v299_v54 = vadd.f32 %v297_v28, %v293_v42  ;;  %v377_v60 = vstv %s1720_s2  ;;  %v381_v18 = vstv %s1731_s4 }
  0x51   :  { %s1794_s16 = sld [smem:[#allocation2 + $0x3f]]  ;;  %v340_v14 = vadd.f32 %v338_v22, %v334_v58  ;;  %v1194_v21 = vpop.eup %1193  ;;  %v315_v36 = vmul.f32 %v1478_v61, %v313_v53  ;;  %v350_v43 = vmul.f32 %v1192_v59, %v349_v31  ;;  %v378_v46 = vmul.f32 %v1192_v59, %v377_v60 }
  0x52   :  { %s1798_s27 = sld [smem:[#allocation2 + $0x40]]  ;;  %v305_v47 = vadd.f32 %v303_v6, %v299_v54  ;;  %v405_v23 = vstv %s1759_s10  ;;  %v271_v56 = vadd.f32 %v269_v26, %v265_v17  ;;  %v354_v27 = vmul.f32 %v1194_v21, %v353_v40 }
  0x53   :  { %s1803_s29 = sld [smem:[#allocation2 + $0x41]]  ;;  %v344_v8 = vadd.f32 %v343_v41, %v340_v14  ;;  %v409_v24 = vstv %s1764_s28  ;;  %v382_v29 = vmul.f32 %v1194_v21, %v381_v18  ;;  %v321_v61 = vmul.f32 %v1499_v15, %v319_v11 }
  0x54   :  { %s1810_s20 = sld [smem:[#allocation2 + $0x42]]  ;;  %v311_v33 = vadd.f32 %v309_v0, %v305_v47  ;;  %v359_v53 = vstv %s1705_s26  ;;  %v387_v52 = vstv %s1737_s11  ;;  %v406_v63 = vmul.f32 %v1192_v59, %v405_v23 }
  0x55   :  { %s1816_s1 = sld [smem:[#allocation2 + $0x43]]  ;;  %1199 = vtanh.f32 %v344_v8  ;;  %v410_v2 = vmul.f32 %v1194_v21, %v409_v24  ;;  %v415_v34 = vstv %s1778_s15  ;;  %v275_v13 = vadd.f32 %v273_v45, %v271_v56 }
  0x56   :  { %s1823_s19 = sld [smem:[#allocation2 + $0x46]]  ;;  %1201 = vtanh.f32 %v205_v32  ;;  %v317_v50 = vadd.f32 %v315_v36, %v311_v33  ;;  %v327_v15 = vmul.f32 %v1514_v25, %v325_v19  ;;  %v356_v11 = vadd.f32 %v354_v27, %v350_v43 }
  0x57   :  { %s1827_s18 = sld [smem:[#allocation2 + $0x44]]  ;;  %v1196_v4 = vpop.eup %1195  ;;  %v384_v30 = vadd.f32 %v382_v29, %v378_v46  ;;  %v333_v7 = vmul.f32 %v1584_v5, %v331_v38  ;;  %v412_v10 = vadd.f32 %v410_v2, %v406_v63  ;;  %1203 = vtanh.f32 %v275_v13 }
  0x58   :  { %s1836_s7 = sld [smem:[#allocation2 + $0x47]]  ;;  %v323_v48 = vadd.f32 %v321_v61, %v317_v50  ;;  %v360_v45 = vmul.f32 %v1196_v4, %v359_v53  ;;  %v388_v49 = vmul.f32 %v1196_v4, %v387_v52  ;;  %v416_v25 = vmul.f32 %v1196_v4, %v415_v34 }
  0x59   :  { %s1842_s14 = sld [smem:[#allocation2 + $0x45]]  ;;  %v339_v57 = vmul.f32 %v1589_v16, %v337_v12  ;;  %v365_v5 = vstv %s1709_s3  ;;  %v393_v38 = vstv %s1747_s5  ;;  %v421_v39 = vstv %s1780_s9 }
  0x5a   :  { %s1853_s17 = sld [smem:[#allocation2 + $0x48]]  ;;  %v329_v19 = vadd.f32 %v327_v15, %v323_v48  ;;  %v362_v37 = vadd.f32 %v360_v45, %v356_v11  ;;  %v390_v22 = vadd.f32 %v388_v49, %v384_v30  ;;  %v418_v55 = vadd.f32 %v416_v25, %v412_v10 }
  0x5b   :  { %s1856_s30 = sld [smem:[#allocation2 + $0x49]]  ;;  %v399_v20 = vstv %s1750_s6  ;;  %v427_v28 = vstv %s1785_s12  ;;  %v433_v46 = vstv %s1794_s16  ;;  %v443_v63 = vstv %s1803_s29 }
  0x5c   :  { %s1863_s8 = sld [smem:[#allocation2 + $0x4a]]  ;;  %v335_v44 = vadd.f32 %v333_v7, %v329_v19  ;;  %v1198_v9 = vpop.eup %1197  ;;  %v449_v10 = vstv %s1810_s20  ;;  %v455_v19 = vstv %s1816_s1 }
  0x5d   :  { %s1876_s21 = sld [smem:[#allocation2 + $0x55]]  ;;  %v379_v32 = vmul.f32 %v1198_v9, %v377_v60  ;;  %v407_v21 = vmul.f32 %v1198_v9, %v405_v23 }
  0x5e   :  { %s1878_s0 = sld [smem:[#allocation2 + $0x4c]]  ;;  %v341_v12 = vadd.f32 %v339_v57, %v335_v44  ;;  %v465_v57 = vstv %s1827_s18  ;;  %v469_v44 = vstv %s1836_s7 }
  0x5f   :  { %s1883_s22 = sld [smem:[#allocation2 + $0x4d]] }
  0x60   :  { %2776 = sst [smem:[#allocation6_spill]] %s1853_s17  ;;  %v345_v51 = vadd.f32 %v343_v41, %v341_v12  ;;  %v351_v41 = vmul.f32 %v1198_v9, %v349_v31 }
  0x61   :  { %2777 = sst [smem:[#allocation7_spill]] %s1856_s30 }
  0x62   :  { %2778 = sst [smem:[#allocation8_spill]] %s1863_s8  ;;  %v1200_v16 = vpop.eup %1199  ;;  %1205 = vtanh.f32 %v345_v51  ;;  %v485_v51 = vstv %s1856_s30 }
  0x63   :  { %s1865_s17 = sld [smem:[#allocation2 + $0x4b]]  ;;  %v366_v35 = vmul.f32 %v1200_v16, %v365_v5  ;;  %v394_v1 = vmul.f32 %v1200_v16, %v393_v38  ;;  %v422_v59 = vmul.f32 %v1200_v16, %v421_v39  ;;  %v1202_v58 = vpop.eup %1201 }
  0x64   :  { %2780 = sst [smem:[#allocation10_spill]] %s1876_s21  ;;  %v355_v8 = vmul.f32 %v1202_v58, %v353_v40  ;;  %v383_v54 = vmul.f32 %v1202_v58, %v381_v18  ;;  %v411_v0 = vmul.f32 %v1202_v58, %v409_v24  ;;  %v1204_v31 = vpop.eup %1203 }
  0x65   :  { %2781 = sst [smem:[#allocation11_spill]] %s1878_s0  ;;  %v368_v62 = vadd.f32 %v366_v35, %v362_v37  ;;  %v396_v14 = vadd.f32 %v394_v1, %v390_v22  ;;  %v424_v42 = vadd.f32 %v422_v59, %v418_v55  ;;  %v361_v60 = vmul.f32 %v1204_v31, %v359_v53 }
  0x66   :  { %2782 = sst [smem:[#allocation12_spill]] %s1883_s22  ;;  %v357_v47 = vadd.f32 %v355_v8, %v351_v41  ;;  %v385_v40 = vadd.f32 %v383_v54, %v379_v32  ;;  %v389_v18 = vmul.f32 %v1204_v31, %v387_v52  ;;  %v413_v23 = vadd.f32 %v411_v0, %v407_v21 }
  0x67   :  { %s1888_s8 = sld [smem:[#allocation2 + $0x4e]]  ;;  %v400_v17 = vadd.f32 %v399_v20, %v396_v14  ;;  %v428_v26 = vadd.f32 %v427_v28, %v424_v42  ;;  %v417_v24 = vmul.f32 %v1204_v31, %v415_v34  ;;  %v437_v53 = vstv %s1798_s27 }
  0x68   :  { %s1890_s24 = sld [smem:[#allocation2 + $0x56]]  ;;  %v363_v56 = vadd.f32 %v361_v60, %v357_v47  ;;  %v391_v36 = vadd.f32 %v389_v18, %v385_v40 }
  0x69   :  { %2779 = sst [smem:[#allocation9_spill]] %s1865_s17  ;;  %v419_v43 = vadd.f32 %v417_v24, %v413_v23 }
  0x6a   :  { %s2783_s17 = sld [smem:[#allocation5_spill]] }
  0x6b   :  { %s1892_s0 = sld [smem:[#allocation2 + $0x4f]] }
  0x6c   :  { %s1919_s25 = sld [smem:[#allocation2 + $0x53]] }
  0x6d   :  { %2784 = sst [smem:[#allocation5_spill]] %s1888_s8 }
  0x6e   :  { %2785 = sst [smem:[#allocation13_spill]] %s1890_s24 }
  0x6f   :  { %s1900_s8 = sld [smem:[#allocation2 + $0x50]]  ;;  %v1206_v27 = vpop.eup %1205 }
  0x70   :  { %v371_v3 = vstv %s2783_s17  ;;  %s1905_s24 = sld [smem:[#allocation2 + $0x51]]  ;;  %v367_v29 = vmul.f32 %v1206_v27, %v365_v5  ;;  %v395_v33 = vmul.f32 %v1206_v27, %v393_v38  ;;  %v423_v61 = vmul.f32 %v1206_v27, %v421_v39 }
  0x71   :  { %2786 = sst [smem:[#allocation14_spill]] %s1892_s0  ;;  %v372_v6 = vadd.f32 %v371_v3, %v368_v62  ;;  %v475_v5 = vstv %s1842_s14  ;;  %v459_v39 = vstv %s1823_s19 }
  0x72   :  { %s1909_s0 = sld [smem:[#allocation2 + $0x57]]  ;;  %v369_v2 = vadd.f32 %v367_v29, %v363_v56  ;;  %v397_v4 = vadd.f32 %v395_v33, %v391_v36  ;;  %v425_v34 = vadd.f32 %v423_v61, %v419_v43  ;;  %v555_v40 = vstv %s1919_s25 }
  0x73   :  { %2791 = sst [smem:[#allocation19_spill]] %s1919_s25  ;;  %1207 = vtanh.f32 %v372_v6  ;;  %v501_v6 = vstv %s1876_s21 }
  0x74   :  { %s1925_s22 = sld [smem:[#allocation2 + $0x58]]  ;;  %1209 = vtanh.f32 %v400_v17  ;;  %v373_v30 = vadd.f32 %v371_v3, %v369_v2  ;;  %v401_v48 = vadd.f32 %v399_v20, %v397_v4  ;;  %v429_v7 = vadd.f32 %v427_v28, %v425_v34 }
  0x75   :  { %2787 = sst [smem:[#allocation15_spill]] %s1900_s8  ;;  %1211 = vtanh.f32 %v428_v26 }
  0x76   :  { %2788 = sst [smem:[#allocation16_spill]] %s1905_s24  ;;  %1213 = vtanh.f32 %v373_v30 }
  0x77   :  { %s1911_s8 = sld [smem:[#allocation2 + $0x52]]  ;;  %1215 = vtanh.f32 %v401_v48 }
  0x78   :  { %2789 = sst [smem:[#allocation17_spill]] %s1909_s0  ;;  %1217 = vtanh.f32 %v429_v7  ;;  %v545_v31 = vstv %s1909_s0 }
  0x79   :  { %s1921_s24 = sld [smem:[#allocation2 + $0x54]] }
  0x7a   :  { %2793 = sst [smem:[#allocation21_spill]] %s1925_s22 }
  0x7b   :  { %s1939_s23 = sld [smem:[#allocation2 + $0x5a]] }
  0x7c   :  { %s1941_s22 = sld [smem:[#allocation2 + $0x5b]] }
  0x7d   :  { %2790 = sst [smem:[#allocation18_spill]] %s1911_s8  ;;  %v551_v47 = vstv %s1911_s8 }
  0x7e   :  { %s1943_s2 = sld [smem:[#allocation2 + $0x5c]] }
  0x7f   :  { %2792 = sst [smem:[#allocation20_spill]] %s1921_s24 }
  0x80   :  { %s1937_s24 = sld [smem:[#allocation2 + $0x59]]  ;;  %v1208_v52 = vpop.eup %1207 }
  0x81   :  { %2795 = sst [smem:[#allocation23_spill]] %s1939_s23  ;;  %v1210_v13 = vpop.eup %1209  ;;  %v434_v50 = vmul.f32 %v1208_v52, %v433_v46  ;;  %v2764_v56 = vstv %s1939_s23 }
  0x82   :  { %2796 = sst [smem:[#allocation24_spill]] %s1941_s22  ;;  %v1212_v15 = vpop.eup %1211  ;;  %v438_v11 = vmul.f32 %v1210_v13, %v437_v53  ;;  %v2760_v36 = vstv %s1941_s22 }
  0x83   :  { %s1951_s13 = sld [smem:[#allocation2 + $0x85]]  ;;  %v444_v45 = vmul.f32 %v1212_v15, %v443_v63  ;;  %v1214_v1 = vpop.eup %1213 }
  0x84   :  { %2797 = sst [smem:[#allocation25_spill]] %s1943_s2  ;;  %v440_v49 = vadd.f32 %v438_v11, %v434_v50  ;;  %v1216_v59 = vpop.eup %1215  ;;  %v435_v58 = vmul.f32 %v1214_v1, %v433_v46  ;;  %v2758_v29 = vstv %s1943_s2 }
  0x85   :  { %s1953_s28 = sld [smem:[#allocation2 + $0x5d]]  ;;  %v1218_v3 = vpop.eup %1217  ;;  %v439_v20 = vmul.f32 %v1216_v59, %v437_v53 }
  0x86   :  { %2794 = sst [smem:[#allocation22_spill]] %s1937_s24  ;;  %v446_v25 = vadd.f32 %v444_v45, %v440_v49  ;;  %v445_v28 = vmul.f32 %v1218_v3, %v443_v63  ;;  %v2766_v24 = vstv %s1937_s24 }
  0x87   :  { %s1955_s4 = sld [smem:[#allocation2 + $0x5e]]  ;;  %v441_v62 = vadd.f32 %v439_v20, %v435_v58 }
  0x88   :  { %s1957_s10 = sld [smem:[#allocation2 + $0x5f]]  ;;  %v450_v38 = vadd.f32 %v449_v10, %v446_v25 }
  0x89   :  { %2798 = sst [smem:[#allocation26_spill]] %s1951_s13  ;;  %v447_v32 = vadd.f32 %v445_v28, %v441_v62  ;;  %v595_v33 = vstv %s1951_s13 }
  0x8a   :  { %s1959_s26 = sld [smem:[#allocation2 + $0x60]]  ;;  %v456_v37 = vmul.f32 %v455_v19, %v450_v38  ;;  %v466_v22 = vmul.f32 %v465_v57, %v450_v38  ;;  %v476_v55 = vmul.f32 %v475_v5, %v450_v38 }
  0x8b   :  { %2799 = sst [smem:[#allocation27_spill]] %s1953_s28  ;;  %v451_v18 = vadd.f32 %v449_v10, %v447_v32 }
  0x8c   :  { %s1961_s11 = sld [smem:[#allocation2 + $0x86]]  ;;  %v460_v16 = vadd.f32 %v459_v39, %v456_v37  ;;  %v470_v12 = vadd.f32 %v469_v44, %v466_v22 }
  0x8d   :  { %2800 = sst [smem:[#allocation28_spill]] %s1955_s4  ;;  %v457_v27 = vmul.f32 %v455_v19, %v451_v18  ;;  %v467_v46 = vmul.f32 %v465_v57, %v451_v18 }
  0x8e   :  { %2801 = sst [smem:[#allocation29_spill]] %s1957_s10  ;;  %1219 = vtanh.f32 %v460_v16 }
  0x8f   :  { %s1970_s15 = sld [smem:[#allocation2 + $0x61]]  ;;  %1221 = vtanh.f32 %v470_v12  ;;  %v461_v19 = vadd.f32 %v459_v39, %v457_v27  ;;  %v471_v57 = vadd.f32 %v469_v44, %v467_v46 }
  0x90   :  { %2802 = sst [smem:[#allocation30_spill]] %s1959_s26 }
  0x91   :  { %s1973_s10 = sld [smem:[#allocation2 + $0x62]] }
  0x92   :  { %2803 = sst [smem:[#allocation31_spill]] %s1961_s11 }
  0x93   :  { %s1976_s3 = sld [smem:[#allocation2 + $0x63]] }
  0x94   :  { %s1980_s5 = sld [smem:[#allocation2 + $0x64]] }
  0x95   :  { %2804 = sst [smem:[#allocation32_spill]] %s1970_s15 }
  0x96   :  { %s1988_s9 = sld [smem:[#allocation2 + $0x87]] }
  0x97   :  { %2805 = sst [smem:[#allocation33_spill]] %s1973_s10 }
  0x98   :  { %s1990_s27 = sld [smem:[#allocation2 + $0x65]] }
  0x99   :  { %2806 = sst [smem:[#allocation34_spill]] %s1976_s3 }
  0x9a   :  { %2807 = sst [smem:[#allocation35_spill]] %s1980_s5 }
  0x9b   :  { %s2810_s29 = sld [smem:[#allocation6_spill]]  ;;  %v1220_v43 = vpop.eup %1219 }
  0x9c   :  { %2808 = sst [smem:[#allocation36_spill]] %s1988_s9  ;;  %v1222_v61 = vpop.eup %1221  ;;  %v486_v53 = vmul.f32 %v1220_v43, %v485_v51  ;;  %v552_v2 = vmul.f32 %v1220_v43, %v551_v47 }
  0x9d   :  { %s1992_s17 = sld [smem:[#allocation2 + $0x66]]  ;;  %v556_v15 = vmul.f32 %v1222_v61, %v555_v40 }
  0x9e   :  { %2809 = sst [smem:[#allocation37_spill]] %s1990_s27 }
  0x9f   :  { %s1995_s6 = sld [smem:[#allocation2 + $0x67]]  ;;  %v558_v25 = vadd.f32 %v556_v15, %v552_v2 }
  0xa0   :  { %s1997_s12 = sld [smem:[#allocation2 + $0x68]] }
  0xa1   :  { %s2002_s27 = sld [smem:[#allocation2 + $0x88]]  ;;  %v479_v9 = vstv %s2810_s29 }
  0xa2   :  { %s2024_s3 = sld [smem:[#allocation2 + $0x6c]]  ;;  %v480_v35 = vadd.f32 %v479_v9, %v476_v55 }
  0xa3   :  { %2811 = sst [smem:[#allocation38_spill]] %s1992_s17 }
  0xa4   :  { %s2006_s17 = sld [smem:[#allocation2 + $0x69]]  ;;  %1223 = vtanh.f32 %v480_v35 }
  0xa5   :  { %2812 = sst [smem:[#allocation39_spill]] %s1995_s6  ;;  %1225 = vtanh.f32 %v461_v19 }
  0xa6   :  { %2813 = sst [smem:[#allocation40_spill]] %s1997_s12  ;;  %1227 = vtanh.f32 %v471_v57 }
  0xa7   :  { %2814 = sst [smem:[#allocation41_spill]] %s2002_s27 }
  0xa8   :  { %s2011_s6 = sld [smem:[#allocation2 + $0x6a]] }
  0xa9   :  { %s2817_s12 = sld [smem:[#allocation70_spill]] }
  0xaa   :  { %2815 = sst [smem:[#allocation42_spill]] %s2006_s17 }
  0xab   :  { %s2022_s27 = sld [smem:[#allocation2 + $0x6b]] }
  0xac   :  { %2819 = sst [smem:[#allocation45_spill]] %s2024_s3 }
  0xad   :  { %s2034_s5 = sld [smem:[#allocation2 + $0x6d]] }
  0xae   :  { %2816 = sst [smem:[#allocation43_spill]] %s2011_s6 }
  0xaf   :  { %452 = vst [vmem:[%s2817_s12] sm:$0xff] %v450_v38  ;;  %s2032_s6 = sld [smem:[#allocation2 + $0x89]]  ;;  %453 = vst [vmem:[%s2817_s12 + $0x8] sm:$0xff] %v451_v18  ;;  %v477_v38 = vmul.f32 %v475_v5, %v451_v18 }
  0xb0   :  { %s2036_s9 = sld [smem:[#allocation2 + $0x6e]] }
  0xb1   :  { %2818 = sst [smem:[#allocation44_spill]] %s2022_s27  ;;  %v1224_v4 = vpop.eup %1223  ;;  %v481_v62 = vadd.f32 %v479_v9, %v477_v38 }
  0xb2   :  { %s2038_s17 = sld [smem:[#allocation2 + $0x6f]] }
  0xb3   :  { %2821 = sst [smem:[#allocation47_spill]] %s2034_s5 }
  0xb4   :  { %s2824_s27 = sld [smem:[#allocation8_spill]] }
  0xb5   :  { %2820 = sst [smem:[#allocation46_spill]] %s2032_s6 }
  0xb6   :  { %2822 = sst [smem:[#allocation48_spill]] %s2036_s9 }
  0xb7   :  { %s2825_s3 = sld [smem:[#allocation9_spill]] }
  0xb8   :  { %2823 = sst [smem:[#allocation49_spill]] %s2038_s17 }
  0xb9   :  { %s2040_s10 = sld [smem:[#allocation2 + $0x70]] }
  0xba   :  { %s2827_s29 = sld [smem:[#allocation11_spill]]  ;;  %v489_v14 = vstv %s2824_s27 }
  0xbb   :  { %s2042_s15 = sld [smem:[#allocation2 + $0x8a]]  ;;  %v490_v34 = vmul.f32 %v1222_v61, %v489_v14 }
  0xbc   :  { %s2829_s5 = sld [smem:[#allocation12_spill]] }
  0xbd   :  { %s2830_s6 = sld [smem:[#allocation5_spill]]  ;;  %v495_v42 = vstv %s2825_s3  ;;  %v492_v45 = vadd.f32 %v490_v34, %v486_v53 }
  0xbe   :  { %s2046_s11 = sld [smem:[#allocation2 + $0x71]]  ;;  %v496_v11 = vmul.f32 %v1224_v4, %v495_v42 }
  0xbf   :  { %2826 = sst [smem:[#allocation50_spill]] %s2040_s10 }
  0xc0   :  { %s2832_s9 = sld [smem:[#allocation13_spill]]  ;;  %v507_v17 = vstv %s2827_s29  ;;  %v498_v22 = vadd.f32 %v496_v11, %v492_v45 }
  0xc1   :  { %2828 = sst [smem:[#allocation51_spill]] %s2042_s15  ;;  %v508_v52 = vmul.f32 %v1220_v43, %v507_v17 }
  0xc2   :  { %s2048_s17 = sld [smem:[#allocation2 + $0x72]]  ;;  %v511_v26 = vstv %s2829_s5  ;;  %v502_v35 = vadd.f32 %v501_v6, %v498_v22 }
  0xc3   :  { %s2834_s26 = sld [smem:[#allocation14_spill]]  ;;  %v517_v41 = vstv %s2830_s6  ;;  %v512_v13 = vmul.f32 %v1222_v61, %v511_v26 }
  0xc4   :  { %2831 = sst [smem:[#allocation52_spill]] %s2046_s11  ;;  %v518_v30 = vmul.f32 %v1224_v4, %v517_v41  ;;  %1229 = vtanh.f32 %v502_v35 }
  0xc5   :  { %s2835_s10 = sld [smem:[#allocation15_spill]]  ;;  %v514_v49 = vadd.f32 %v512_v13, %v508_v52 }
  0xc6   :  { %s2050_s4 = sld [smem:[#allocation2 + $0x73]]  ;;  %v523_v8 = vstv %s2832_s9 }
  0xc7   :  { %s2837_s28 = sld [smem:[#allocation16_spill]]  ;;  %v520_v55 = vadd.f32 %v518_v30, %v514_v49 }
  0xc8   :  { %2833 = sst [smem:[#allocation53_spill]] %s2048_s17 }
  0xc9   :  { %s2053_s16 = sld [smem:[#allocation2 + $0x74]]  ;;  %v529_v54 = vstv %s2834_s26  ;;  %v524_v1 = vadd.f32 %v523_v8, %v520_v55 }
  0xca   :  { %s2839_s11 = sld [smem:[#allocation20_spill]]  ;;  %v530_v63 = vmul.f32 %v1220_v43, %v529_v54 }
  0xcb   :  { %s2059_s17 = sld [smem:[#allocation2 + $0x8b]]  ;;  %v533_v21 = vstv %s2835_s10  ;;  %1231 = vtanh.f32 %v524_v1 }
  0xcc   :  { %2836 = sst [smem:[#allocation54_spill]] %s2050_s4  ;;  %v534_v50 = vmul.f32 %v1222_v61, %v533_v21 }
  0xcd   :  { %s2841_s15 = sld [smem:[#allocation21_spill]]  ;;  %v539_v0 = vstv %s2837_s28 }
  0xce   :  { %s2064_s4 = sld [smem:[#allocation2 + $0x75]]  ;;  %v540_v48 = vmul.f32 %v1224_v4, %v539_v0  ;;  %v536_v10 = vadd.f32 %v534_v50, %v530_v63 }
  0xcf   :  { %2838 = sst [smem:[#allocation55_spill]] %s2053_s16 }
  0xd0   :  { %s2070_s16 = sld [smem:[#allocation2 + $0x76]]  ;;  %v561_v60 = vstv %s2839_s11  ;;  %v542_v16 = vadd.f32 %v540_v48, %v536_v10 }
  0xd1   :  { %2840 = sst [smem:[#allocation56_spill]] %s2059_s17  ;;  %v562_v7 = vmul.f32 %v1224_v4, %v561_v60 }
  0xd2   :  { %s2077_s17 = sld [smem:[#allocation2 + $0x77]]  ;;  %v546_v59 = vadd.f32 %v545_v31, %v542_v16 }
  0xd3   :  { %v567_v23 = vstv %s2841_s15  ;;  %s2094_s20 = sld [smem:[#allocation2 + $0x8c]]  ;;  %v564_v12 = vadd.f32 %v562_v7, %v558_v25 }
  0xd4   :  { %2842 = sst [smem:[#allocation57_spill]] %s2064_s4  ;;  %1233 = vtanh.f32 %v546_v59 }
  0xd5   :  { %s2083_s4 = sld [smem:[#allocation2 + $0x78]]  ;;  %v568_v3 = vadd.f32 %v567_v23, %v564_v12 }
  0xd6   :  { %2843 = sst [smem:[#allocation58_spill]] %s2070_s16 }
  0xd7   :  { %s2104_s1 = sld [smem:[#allocation2 + $0x79]]  ;;  %1235 = vtanh.f32 %v568_v3  ;;  %v1226_v3 = vpop.eup %1225 }
  0xd8   :  { %2844 = sst [smem:[#allocation59_spill]] %s2077_s17  ;;  %1237 = vtanh.f32 %v481_v62  ;;  %v841_v57 = vstv %s2077_s17  ;;  %v487_v22 = vmul.f32 %v1226_v3, %v485_v51  ;;  %v509_v12 = vmul.f32 %v1226_v3, %v507_v17  ;;  %v1228_v59 = vpop.eup %1227 }
  0xd9   :  { %2845 = sst [smem:[#allocation60_spill]] %s2094_s20  ;;  %v531_v35 = vmul.f32 %v1226_v3, %v529_v54  ;;  %v553_v1 = vmul.f32 %v1226_v3, %v551_v47  ;;  %v2221_v34 = vpop.eup %1229  ;;  %v491_v38 = vmul.f32 %v1228_v59, %v489_v14  ;;  %v513_v51 = vmul.f32 %v1228_v59, %v511_v26 }
  0xda   :  { %s2846_s18 = sld [smem:[#allocation27_spill]]  ;;  %v535_v17 = vmul.f32 %v1228_v59, %v533_v21  ;;  %v557_v54 = vmul.f32 %v1228_v59, %v555_v40  ;;  %v2231_v47 = vpop.eup %1231  ;;  %v574_v3 = vmul.f32 %v2221_v34, %v2766_v24 }
  0xdb   :  { %s2114_s0 = sld [smem:[#allocation2 + $0x7a]]  ;;  %v493_v40 = vadd.f32 %v491_v38, %v487_v22  ;;  %v515_v59 = vadd.f32 %v513_v51, %v509_v12  ;;  %v578_v30 = vmul.f32 %v2231_v47, %v2764_v56 }
  0xdc   :  { %s2124_s12 = sld [smem:[#allocation2 + $0x7b]]  ;;  %v537_v55 = vadd.f32 %v535_v17, %v531_v35  ;;  %v559_v62 = vadd.f32 %v557_v54, %v553_v1 }
  0xdd   :  { %s2849_s16 = sld [smem:[#allocation28_spill]] }
  0xde   :  { %s2850_s13 = sld [smem:[#allocation29_spill]] }
  0xdf   :  { %s2851_s2 = sld [smem:[#allocation30_spill]] }
  0xe0   :  { %s2126_s22 = sld [smem:[#allocation2 + $0x7c]]  ;;  %v2765_v37 = vstv %s2846_s18 }
  0xe1   :  { %2847 = sst [smem:[#allocation61_spill]] %s2114_s0  ;;  %v610_v10 = vmul.f32 %v2221_v34, %v2765_v37  ;;  %v2245_v21 = vpop.eup %1233 }
  0xe2   :  { %2848 = sst [smem:[#allocation62_spill]] %s2124_s12 }
  0xe3   :  { %s2854_s28 = sld [smem:[#allocation31_spill]]  ;;  %v2761_v39 = vstv %s2849_s16 }
  0xe4   :  { %s2135_s6 = sld [smem:[#allocation2 + $0x8d]]  ;;  %v2757_v44 = vstv %s2850_s13  ;;  %v2247_v16 = vpop.eup %1235 }
  0xe5   :  { %s2856_s3 = sld [smem:[#allocation32_spill]]  ;;  %v2759_v5 = vstv %s2851_s2  ;;  %v620_v38 = vmul.f32 %v2245_v21, %v2757_v44  ;;  %v1238_v22 = vpop.eup %1237  ;;  %v590_v12 = vmul.f32 %v2247_v16, %v2758_v29 }
  0xe6   :  { %2852 = sst [smem:[#allocation63_spill]] %s2126_s22  ;;  %v626_v35 = vmul.f32 %v2247_v16, %v2759_v5  ;;  %v497_v17 = vmul.f32 %v1238_v22, %v495_v42  ;;  %v519_v54 = vmul.f32 %v1238_v22, %v517_v41  ;;  %v541_v44 = vmul.f32 %v1238_v22, %v539_v0 }
  0xe7   :  { %s2857_s23 = sld [smem:[#allocation33_spill]]  ;;  %v563_v29 = vmul.f32 %v1238_v22, %v561_v60  ;;  %v580_v5 = vadd.f32 %v578_v30, %v574_v3 }
  0xe8   :  { %s2137_s19 = sld [smem:[#allocation2 + $0x7d]]  ;;  %v521_v56 = vadd.f32 %v519_v54, %v515_v59  ;;  %v543_v42 = vadd.f32 %v541_v44, %v537_v55 }
  0xe9   :  { %s2860_s24 = sld [smem:[#allocation34_spill]]  ;;  %v631_v58 = vstv %s2854_s28  ;;  %v565_v37 = vadd.f32 %v563_v29, %v559_v62 }
  0xea   :  { %2855 = sst [smem:[#allocation64_spill]] %s2135_s6  ;;  %v525_v30 = vadd.f32 %v523_v8, %v521_v56 }
  0xeb   :  { %s2861_s14 = sld [smem:[#allocation35_spill]]  ;;  %v2755_v20 = vstv %s2856_s3  ;;  %v569_v44 = vadd.f32 %v567_v23, %v565_v37 }
  0xec   :  { %s2142_s25 = sld [smem:[#allocation2 + $0x7e]]  ;;  %v647_v14 = vmul.f32 %v2221_v34, %v2755_v20  ;;  %v584_v20 = vmul.f32 %v2245_v21, %v2760_v36 }
  0xed   :  { %s2863_s18 = sld [smem:[#allocation36_spill]]  ;;  %v2762_v28 = vstv %s2857_s23 }
  0xee   :  { %2858 = sst [smem:[#allocation65_spill]] %s2137_s19  ;;  %v651_v1 = vmul.f32 %v2231_v47, %v2762_v28  ;;  %v586_v41 = vadd.f32 %v584_v20, %v580_v5 }
  0xef   :  { %s2864_s10 = sld [smem:[#allocation37_spill]]  ;;  %v2763_v32 = vstv %s2860_s24 }
  0xf0   :  { %s2865_s5 = sld [smem:[#allocation38_spill]]  ;;  %v657_v51 = vmul.f32 %v2245_v21, %v2763_v32  ;;  %v499_v32 = vadd.f32 %v497_v17, %v493_v40  ;;  %v592_v29 = vadd.f32 %v590_v12, %v586_v41 }
  0xf1   :  { %s2151_s27 = sld [smem:[#allocation2 + $0x7f]]  ;;  %v662_v18 = vstv %s2861_s14 }
  0xf2   :  { %2862 = sst [smem:[#allocation6_spill]] %s2142_s25  ;;  %v663_v28 = vmul.f32 %v2247_v16, %v662_v18  ;;  %v596_v8 = vadd.f32 %v595_v33, %v592_v29 }
  0xf3   :  { %s2867_s16 = sld [smem:[#allocation39_spill]]  ;;  %v668_v43 = vstv %s2863_s18 }
  0xf4   :  { %s2868_s13 = sld [smem:[#allocation40_spill]] }
  0xf5   :  { %s2869_s2 = sld [smem:[#allocation41_spill]]  ;;  %v2756_v27 = vstv %s2864_s10 }
  0xf6   :  { %s2157_s21 = sld [smem:[#allocation2 + $0x80]]  ;;  %v687_v46 = vstv %s2865_s5  ;;  %v684_v26 = vmul.f32 %v2221_v34, %v2756_v27  ;;  %v614_v27 = vmul.f32 %v2231_v47, %v2761_v39  ;;  %v653_v39 = vadd.f32 %v651_v1, %v647_v14 }
  0xf7   :  { %2866 = sst [smem:[#allocation66_spill]] %s2151_s27  ;;  %v688_v60 = vmul.f32 %v2231_v47, %v687_v46 }
  0xf8   :  { %s2871_s9 = sld [smem:[#allocation42_spill]]  ;;  %v616_v36 = vadd.f32 %v614_v27, %v610_v10  ;;  %v659_v0 = vadd.f32 %v657_v51, %v653_v39  ;;  %v503_v27 = vadd.f32 %v501_v6, %v499_v32  ;;  %v547_v10 = vadd.f32 %v545_v31, %v543_v42 }
  0xf9   :  { %s2872_s11 = sld [smem:[#allocation43_spill]]  ;;  %v693_v61 = vstv %s2867_s16  ;;  %v690_v20 = vadd.f32 %v688_v60, %v684_v26 }
  0xfa   :  { %s2873_s8 = sld [smem:[#allocation44_spill]]  ;;  %v699_v9 = vstv %s2868_s13  ;;  %v622_v24 = vadd.f32 %v620_v38, %v616_v36  ;;  %v665_v36 = vadd.f32 %v663_v28, %v659_v0  ;;  %1239 = vtanh.f32 %v503_v27 }
  0xfb   :  { %s2163_s28 = sld [smem:[#allocation2 + $0x8e]]  ;;  %v705_v53 = vstv %s2869_s2  ;;  %v694_v39 = vmul.f32 %v2245_v21, %v693_v61  ;;  %v700_v55 = vmul.f32 %v2247_v16, %v699_v9  ;;  %1241 = vtanh.f32 %v525_v30 }
  0xfc   :  { %2870 = sst [smem:[#allocation67_spill]] %s2157_s21  ;;  %v628_v5 = vadd.f32 %v626_v35, %v622_v24  ;;  %v669_v23 = vadd.f32 %v668_v43, %v665_v36  ;;  %1243 = vtanh.f32 %v547_v10  ;;  %v598_v28 = vmul.f32 0.5, %v596_v8 }
  0xfd   :  { %s2875_s15 = sld [smem:[#allocation45_spill]]  ;;  %v696_v24 = vadd.f32 %v694_v39, %v690_v20  ;;  %1245 = vtanh.f32 %v569_v44  ;;  %v842_v44 = vmul.f32 %v2245_v21, %v841_v57  ;;  %v2947_v36 = vstv %s2083_s4 }
  0xfe   :  { %s2877_s3 = sld [smem:[#allocation47_spill]]  ;;  %v720_v52 = vstv %s2871_s9  ;;  %v632_v31 = vadd.f32 %v631_v58, %v628_v5  ;;  %v671_v62 = vmul.f32 0.5, %v669_v23  ;;  %1247 = vtanh.f32 %v598_v28 }
  0xff   :  { %s2168_s23 = sld [smem:[#allocation2 + $0x81]]  ;;  %v724_v63 = vstv %s2872_s11  ;;  %v721_v6 = vmul.f32 %v2221_v34, %v720_v52  ;;  %v702_v3 = vadd.f32 %v700_v55, %v696_v24  ;;  %v2359_v20 = vmul.f32 %v2247_v16, %v2947_v36 }
 0x100   :  { %s2879_s29 = sld [smem:[#allocation48_spill]]  ;;  %v730_v2 = vstv %s2873_s8  ;;  %v725_v56 = vmul.f32 %v2231_v47, %v724_v63  ;;  %v634_v32 = vmul.f32 0.5, %v632_v31  ;;  %v2948_v39 = vstv %s2104_s1 }
 0x101   :  { %2874 = sst [smem:[#allocation42_spill]] %s2163_s28  ;;  %v731_v37 = vmul.f32 %v2245_v21, %v730_v2  ;;  %v706_v12 = vadd.f32 %v705_v53, %v702_v3  ;;  %v869_v55 = vmul.f32 %v2221_v34, %v2948_v39  ;;  %v2952_v3 = vstv %s2137_s19 }
 0x102   :  { %s2880_s7 = sld [smem:[#allocation49_spill]]  ;;  %v727_v14 = vadd.f32 %v725_v56, %v721_v6  ;;  %1249 = vtanh.f32 %v634_v32 }
 0x103   :  { %s2881_s30 = sld [smem:[#allocation50_spill]]  ;;  %v736_v4 = vstv %s2875_s15  ;;  %1251 = vtanh.f32 %v671_v62  ;;  %v708_v42 = vmul.f32 0.5, %v706_v12 }
 0x104   :  { %s2883_s14 = sld [smem:[#allocation52_spill]]  ;;  %v757_v13 = vstv %s2877_s3  ;;  %v737_v26 = vmul.f32 %v2247_v16, %v736_v4  ;;  %v733_v35 = vadd.f32 %v731_v37, %v727_v14  ;;  %v2950_v37 = vstv %s2124_s12 }
 0x105   :  { %2878 = sst [smem:[#allocation68_spill]] %s2168_s23  ;;  %v758_v40 = vmul.f32 %v2221_v34, %v757_v13  ;;  %1253 = vtanh.f32 %v708_v42  ;;  %v2370_v28 = vmul.f32 %v2245_v21, %v2950_v37  ;;  %v2380_v14 = vmul.f32 %v2221_v34, %v2952_v3 }
 0x106   :  { %s2173_s21 = sld [smem:[#allocation2 + $0x82]]  ;;  %v761_v50 = vstv %s2879_s29  ;;  %v739_v41 = vadd.f32 %v737_v26, %v733_v35 }
 0x107   :  { %s2885_s28 = sld [smem:[#allocation53_spill]]  ;;  %v762_v59 = vmul.f32 %v2231_v47, %v761_v50  ;;  %v2382_v26 = vpop.eup %1239 }
 0x108   :  { %s2886_s18 = sld [smem:[#allocation54_spill]]  ;;  %v767_v15 = vstv %s2880_s7  ;;  %v2392_v35 = vpop.eup %1241 }
 0x109   :  { %s2887_s10 = sld [smem:[#allocation55_spill]]  ;;  %v773_v11 = vstv %s2881_s30  ;;  %v768_v38 = vmul.f32 %v2245_v21, %v767_v15  ;;  %v764_v51 = vadd.f32 %v762_v59, %v758_v40  ;;  %v689_v39 = vmul.f32 %v2392_v35, %v687_v46 }
 0x10a   :  { %s2889_s23 = sld [smem:[#allocation57_spill]]  ;;  %v794_v48 = vstv %s2883_s14  ;;  %v774_v22 = vmul.f32 %v2247_v16, %v773_v11 }
 0x10b   :  { %s2178_s27 = sld [smem:[#allocation2 + $0x83]]  ;;  %v795_v1 = vmul.f32 %v2221_v34, %v794_v48  ;;  %v770_v27 = vadd.f32 %v768_v38, %v764_v51 }
 0x10c   :  { %2884 = sst [smem:[#allocation69_spill]] %s2173_s21 }
 0x10d   :  { %s2891_s25 = sld [smem:[#allocation58_spill]]  ;;  %v798_v7 = vstv %s2885_s28  ;;  %v776_v6 = vadd.f32 %v774_v22, %v770_v27  ;;  %v2406_v27 = vpop.eup %1243 }
 0x10e   :  { %s2183_s2 = sld [smem:[#allocation2 + $0x84]]  ;;  %v804_v45 = vstv %s2886_s18  ;;  %v799_v17 = vmul.f32 %v2231_v47, %v798_v7 }
 0x10f   :  { %v810_v49 = vstv %s2887_s10  ;;  %s2906_s20 = sld [smem:[#allocation22_spill]]  ;;  %v805_v54 = vmul.f32 %v2245_v21, %v804_v45 }
 0x110   :  { %v831_v25 = vstv %s2889_s23  ;;  %s2907_s0 = sld [smem:[#allocation27_spill]]  ;;  %v811_v0 = vmul.f32 %v2247_v16, %v810_v49  ;;  %v801_v30 = vadd.f32 %v799_v17, %v795_v1 }
 0x111   :  { %2890 = sst [smem:[#allocation54_spill]] %s2178_s27  ;;  %v832_v60 = vmul.f32 %v2221_v34, %v831_v25 }
 0x112   :  { %s2908_s22 = sld [smem:[#allocation32_spill]]  ;;  %v807_v8 = vadd.f32 %v805_v54, %v801_v30 }
 0x113   :  { %v835_v19 = vstv %s2891_s25  ;;  %s2909_s6 = sld [smem:[#allocation37_spill]] }
 0x114   :  { %2892 = sst [smem:[#allocation55_spill]] %s2183_s2  ;;  %v836_v10 = vmul.f32 %v2231_v47, %v835_v19  ;;  %v2386_v38 = vadd.f32 %v811_v0, %v807_v8 }
 0x115   :  { %s2910_s11 = sld [smem:[#allocation23_spill]]  ;;  %v2955_v1 = vstv %s2906_s20 }
 0x116   :  { %s2911_s29 = sld [smem:[#allocation24_spill]]  ;;  %v838_v31 = vadd.f32 %v836_v10, %v832_v60  ;;  %v575_v51 = vmul.f32 %v2382_v26, %v2955_v1  ;;  %v2957_v17 = vstv %s2907_s0 }
 0x117   :  { %s2912_s7 = sld [smem:[#allocation28_spill]]  ;;  %v611_v54 = vmul.f32 %v2382_v26, %v2957_v17 }
 0x118   :  { %s2913_s30 = sld [smem:[#allocation29_spill]]  ;;  %v2388_v22 = vadd.f32 %v842_v44, %v838_v31  ;;  %v2958_v42 = vstv %s2908_s22 }
 0x119   :  { %s2916_s23 = sld [smem:[#allocation33_spill]]  ;;  %v2960_v0 = vstv %s2909_s6 }
 0x11a   :  { %s2917_s25 = sld [smem:[#allocation34_spill]]  ;;  %v685_v60 = vmul.f32 %v2382_v26, %v2960_v0 }
 0x11b   :  { %s2942_s15 = sld [smem:[#allocation46_spill]]  ;;  %v2961_v30 = vstv %s2910_s11 }
 0x11c   :  { %s2943_s16 = sld [smem:[#allocation61_spill]]  ;;  %v579_v10 = vmul.f32 %v2392_v35, %v2961_v30 }
 0x11d   :  { %s2944_s14 = sld [smem:[#allocation63_spill]]  ;;  %v2963_v44 = vstv %s2912_s7 }
 0x11e   :  { %s2945_s28 = sld [smem:[#allocation51_spill]]  ;;  %v2967_v31 = vstv %s2913_s30  ;;  %v581_v3 = vadd.f32 %v579_v10, %v575_v51 }
 0x11f   :  { %s2956_s19 = sld [smem:[#allocation25_spill]] }
 0x120   :  { %s2959_s12 = sld [smem:[#allocation30_spill]] }
 0x121   :  { %v2946_v29 = vstv %s2942_s15  ;;  %s2977_s30 = sld [smem:[#allocation56_spill]] }
 0x122   :  { %v743_v5 = vadd.f32 %v2946_v29, %v739_v41  ;;  %v2949_v23 = vstv %s2943_s16  ;;  %v648_v41 = vmul.f32 %v2382_v26, %v2958_v42  ;;  %v615_v29 = vmul.f32 %v2392_v35, %v2963_v44  ;;  %s2974_s16 = sld [smem:[#allocation71_spill]] }
 0x123   :  { %v873_v24 = vmul.f32 %v2231_v47, %v2949_v23  ;;  %v2951_v32 = vstv %s2944_s14  ;;  %v621_v23 = vmul.f32 %v2406_v27, %v2967_v31  ;;  %s2982_s17 = sld [smem:[#allocation60_spill]] }
 0x124   :  { %v745_v56 = vmul.f32 0.5, %v743_v5  ;;  %v2375_v62 = vmul.f32 %v2247_v16, %v2951_v32  ;;  %v2953_v40 = vstv %s2945_s28  ;;  %v2964_v5 = vstv %s2916_s23  ;;  %s2983_s18 = sld [smem:[#allocation61_spill]] }
 0x125   :  { %v780_v59 = vadd.f32 %v2953_v40, %v776_v6  ;;  %v2390_v12 = vadd.f32 %v873_v24, %v869_v55  ;;  %v652_v36 = vmul.f32 %v2392_v35, %v2964_v5  ;;  %v2420_v55 = vpop.eup %1245  ;;  %v2966_v6 = vstv %s2911_s29  ;;  %s2985_s10 = sld [smem:[#allocation62_spill]] }
 0x126   :  { %v585_v8 = vmul.f32 %v2406_v27, %v2966_v6  ;;  %v2968_v24 = vstv %s2917_s25  ;;  %v695_v32 = vmul.f32 %v2406_v27, %v693_v61  ;;  %v2969_v40 = vstv %s2956_s19  ;;  %v1248_v0 = vpop.eup %1247  ;;  %s2988_s2 = sld [smem:[#allocation63_spill]] }
 0x127   :  { %v658_v37 = vmul.f32 %v2406_v27, %v2968_v24  ;;  %v591_v1 = vmul.f32 %v2420_v55, %v2969_v40  ;;  %v617_v17 = vadd.f32 %v615_v29, %v611_v54  ;;  %v2970_v46 = vstv %s2959_s12  ;;  %v1250_v31 = vpop.eup %1249  ;;  %s2989_s3 = sld [smem:[#allocation6_spill]] }
 0x128   :  { %v627_v42 = vmul.f32 %v2420_v55, %v2970_v46  ;;  %v654_v30 = vadd.f32 %v652_v36, %v648_v41  ;;  %v664_v44 = vmul.f32 %v2420_v55, %v662_v18  ;;  %v691_v5 = vadd.f32 %v689_v39, %v685_v60  ;;  %v1252_v54 = vpop.eup %1251  ;;  %s2992_s24 = sld [smem:[#allocation64_spill]] }
 0x129   :  { %v701_v6 = vmul.f32 %v2420_v55, %v699_v9  ;;  %v602_v61 = vadd.f32 1.0, %v1248_v0  ;;  %v587_v51 = vadd.f32 %v585_v8, %v581_v3  ;;  %v623_v10 = vadd.f32 %v621_v23, %v617_v17  ;;  %v1254_v3 = vpop.eup %1253  ;;  %s3006_s27 = sld [smem:[#allocation42_spill]] }
 0x12a   :  { %1255 = vtanh.f32 %v745_v56  ;;  %v638_v29 = vadd.f32 1.0, %v1250_v31  ;;  %v660_v24 = vadd.f32 %v658_v37, %v654_v30  ;;  %v697_v41 = vadd.f32 %v695_v32, %v691_v5  ;;  %s3008_s6 = sld [smem:[#allocation68_spill]] }
 0x12b   :  { %v722_v18 = vmul.f32 %v2382_v26, %v720_v52  ;;  %v604_v60 = vmul.f32 0.5, %v602_v61  ;;  %v593_v36 = vadd.f32 %v591_v1, %v587_v51  ;;  %v629_v9 = vadd.f32 %v627_v42, %v623_v10  ;;  %s3009_s0 = sld [smem:[#allocation69_spill]] }
 0x12c   :  { %v675_v39 = vadd.f32 1.0, %v1252_v54  ;;  %v640_v40 = vmul.f32 0.5, %v638_v29  ;;  %v666_v8 = vadd.f32 %v664_v44, %v660_v24  ;;  %v703_v23 = vadd.f32 %v701_v6, %v697_v41  ;;  %s2573_s12 = sld [smem:[#allocation2 + $0x8f]] }
 0x12d   :  { %v726_v56 = vmul.f32 %v2392_v35, %v724_v63  ;;  %606 = vst [vmem:[%s2974_s16] sm:$0xff] %v604_v60  ;;  %v597_v52 = vadd.f32 %v595_v33, %v593_v36  ;;  %v633_v37 = vadd.f32 %v631_v58, %v629_v9  ;;  %v732_v1 = vmul.f32 %v2406_v27, %v730_v2  ;;  %s3010_s9 = sld [smem:[#allocation54_spill]] }
 0x12e   :  { %v677_v32 = vmul.f32 0.5, %v675_v39  ;;  %1125 = vst [vmem:[%s2974_s16 + $0x10] sm:$0xff] %v640_v40  ;;  %v670_v63 = vadd.f32 %v668_v43, %v666_v8  ;;  %v712_v17 = vadd.f32 1.0, %v1254_v3  ;;  %v707_v46 = vadd.f32 %v705_v53, %v703_v23  ;;  %s3013_s11 = sld [smem:[#allocation55_spill]] }
 0x12f   :  { %v728_v42 = vadd.f32 %v726_v56, %v722_v18  ;;  %v599_v33 = vmul.f32 0.5, %v597_v52  ;;  %v635_v58 = vmul.f32 0.5, %v633_v37  ;;  %v738_v2 = vmul.f32 %v2420_v55, %v736_v4 }
 0x130   :  { %1132 = vst [vmem:[%s2974_s16 + $0x20] sm:$0xff] %v677_v32  ;;  %v782_v0 = vmul.f32 0.5, %v780_v59  ;;  %v672_v30 = vmul.f32 0.5, %v670_v63  ;;  %v714_v43 = vmul.f32 0.5, %v712_v17  ;;  %v709_v44 = vmul.f32 0.5, %v707_v46 }
 0x131   :  { %v734_v53 = vadd.f32 %v732_v1, %v728_v42  ;;  %1257 = vtanh.f32 %v599_v33  ;;  %v759_v5 = vmul.f32 %v2382_v26, %v757_v13  ;;  %v763_v6 = vmul.f32 %v2392_v35, %v761_v50 }
 0x132   :  { %v769_v31 = vmul.f32 %v2406_v27, %v767_v15  ;;  %1259 = vtanh.f32 %v635_v58  ;;  %1139 = vst [vmem:[%s2974_s16 + $0x30] sm:$0xff] %v714_v43  ;;  %v775_v59 = vmul.f32 %v2420_v55, %v773_v11  ;;  %v2980_v61 = vstv %s2977_s30 }
 0x133   :  { %v740_v4 = vadd.f32 %v738_v2, %v734_v53  ;;  %v817_v51 = vadd.f32 %v2980_v61, %v2386_v38  ;;  %1261 = vtanh.f32 %v672_v30  ;;  %v765_v13 = vadd.f32 %v763_v6, %v759_v5 }
 0x134   :  { %v796_v50 = vmul.f32 %v2382_v26, %v794_v48  ;;  %v800_v15 = vmul.f32 %v2392_v35, %v798_v7  ;;  %1263 = vtanh.f32 %v709_v44  ;;  %v2981_v10 = vstv %s2942_s15  ;;  %s2995_s15 = sld [smem:[#allocation67_spill]] }
 0x135   :  { %v744_v54 = vadd.f32 %v2981_v10, %v740_v4  ;;  %v819_v29 = vmul.f32 0.5, %v817_v51  ;;  %v806_v11 = vmul.f32 %v2406_v27, %v804_v45  ;;  %1265 = vtanh.f32 %v782_v0 }
 0x136   :  { %v771_v38 = vadd.f32 %v769_v31, %v765_v13  ;;  %v802_v24 = vadd.f32 %v800_v15, %v796_v50  ;;  %v812_v48 = vmul.f32 %v2420_v55, %v810_v49  ;;  %v850_v18 = vadd.f32 %v2359_v20, %v2388_v22 }
 0x137   :  { %v1256_v41 = vpop.eup %1255  ;;  %v746_v7 = vmul.f32 0.5, %v744_v54  ;;  %1267 = vtanh.f32 %v819_v29  ;;  %v833_v60 = vmul.f32 %v2382_v26, %v831_v25  ;;  %v837_v39 = vmul.f32 %v2392_v35, %v835_v19 }
 0x138   :  { %v749_v45 = vadd.f32 1.0, %v1256_v41  ;;  %v777_v36 = vadd.f32 %v775_v59, %v771_v38  ;;  %v808_v9 = vadd.f32 %v806_v11, %v802_v24  ;;  %v2984_v49 = vstv %s2982_s17 }
 0x139   :  { %1269 = vtanh.f32 %v746_v7  ;;  %v854_v40 = vadd.f32 %v2984_v49, %v850_v18  ;;  %v843_v8 = vmul.f32 %v2406_v27, %v841_v57  ;;  %v2986_v20 = vstv %s2083_s4 }
 0x13a   :  { %v849_v22 = vmul.f32 %v2420_v55, %v2986_v20  ;;  %v751_v23 = vmul.f32 0.5, %v749_v45  ;;  %v2987_v25 = vstv %s2945_s28  ;;  %v814_v3 = vadd.f32 %v812_v48, %v808_v9  ;;  %s2993_s28 = sld [smem:[#allocation66_spill]] }
 0x13b   :  { %v781_v56 = vadd.f32 %v2987_v25, %v777_v36  ;;  %v839_v52 = vadd.f32 %v837_v39, %v833_v60  ;;  %v856_v37 = vmul.f32 0.5, %v854_v40  ;;  %v881_v19 = vadd.f32 %v2370_v28, %v2390_v12 }
 0x13c   :  { %v2990_v32 = vstv %s2104_s1  ;;  %v2991_v63 = vstv %s2983_s18  ;;  %1146 = vst [vmem:[%s2974_s16 + $0x40] sm:$0xff] %v751_v23  ;;  %v2994_v46 = vmov %v2980_v61  ;;  %v2996_v58 = vstv %s2985_s10  ;;  %s2999_s1 = sld [smem:[#allocation65_spill]] }
 0x13d   :  { %v870_v1 = vmul.f32 %v2382_v26, %v2990_v32  ;;  %v874_v57 = vmul.f32 %v2392_v35, %v2991_v63  ;;  %v783_v17 = vmul.f32 0.5, %v781_v56  ;;  %v818_v42 = vadd.f32 %v2994_v46, %v814_v3 }
 0x13e   :  { %v845_v33 = vadd.f32 %v843_v8, %v839_v52  ;;  %v880_v28 = vmul.f32 %v2406_v27, %v2996_v58  ;;  %1271 = vtanh.f32 %v856_v37  ;;  %v887_v12 = vadd.f32 %v2375_v62, %v881_v19  ;;  %v1258_v6 = vpop.eup %1257 }
 0x13f   :  { %v876_v2 = vadd.f32 %v874_v57, %v870_v1  ;;  %v2997_v0 = vstv %s2988_s2  ;;  %1273 = vtanh.f32 %v783_v17  ;;  %v820_v43 = vmul.f32 0.5, %v818_v42  ;;  %v1260_v50 = vpop.eup %1259 }
 0x140   :  { %v886_v30 = vmul.f32 %v2420_v55, %v2997_v0  ;;  %v851_v44 = vadd.f32 %v849_v22, %v845_v33  ;;  %v2998_v53 = vstv %s2989_s3  ;;  %v3000_v31 = vstv %s2992_s24  ;;  %v1262_v11 = vpop.eup %1261 }
 0x141   :  { %v910_v5 = vmul.f32 %v2231_v47, %v2998_v53  ;;  %v891_v4 = vadd.f32 %v3000_v31, %v887_v12  ;;  %v882_v59 = vadd.f32 %v880_v28, %v876_v2  ;;  %v3001_v61 = vstv %s2993_s28  ;;  %v1264_v18 = vpop.eup %1263 }
 0x142   :  { %v916_v51 = vmul.f32 %v2245_v21, %v3001_v61  ;;  %v3002_v13 = vstv %s2995_s15  ;;  %v603_v15 = vadd.f32 1.0, %v1258_v6  ;;  %1275 = vtanh.f32 %v820_v43  ;;  %v1266_v39 = vpop.eup %1265 }
 0x143   :  { %v922_v62 = vmul.f32 %v2247_v16, %v3002_v13  ;;  %v3003_v10 = vmov %v2984_v49  ;;  %v912_v29 = vadd.f32 %v910_v5, %v2380_v14  ;;  %v639_v38 = vadd.f32 1.0, %v1260_v50 }
 0x144   :  { %v855_v54 = vadd.f32 %v3003_v10, %v851_v44  ;;  %v893_v24 = vmul.f32 0.5, %v891_v4  ;;  %v888_v48 = vadd.f32 %v886_v30, %v882_v59  ;;  %v3004_v41 = vstv %s2999_s1  ;;  %v1268_v14 = vpop.eup %1267 }
 0x145   :  { %v907_v7 = vmul.f32 %v2382_v26, %v3004_v41  ;;  %v605_v60 = vmul.f32 0.5, %v603_v15  ;;  %v676_v45 = vadd.f32 1.0, %v1262_v11  ;;  %v918_v9 = vadd.f32 %v916_v51, %v912_v29 }
 0x146   :  { %v857_v36 = vmul.f32 0.5, %v855_v54  ;;  %v641_v49 = vmul.f32 0.5, %v639_v38  ;;  %v713_v40 = vadd.f32 1.0, %v1264_v18  ;;  %1277 = vtanh.f32 %v893_v24  ;;  %v1270_v32 = vpop.eup %1269 }
 0x147   :  { %v3005_v8 = vmov %v3000_v31  ;;  %607 = vst [vmem:[%s2974_s16 + $0x8] sm:$0xff] %v605_v60  ;;  %v678_v22 = vmul.f32 0.5, %v676_v45  ;;  %v786_v23 = vadd.f32 1.0, %v1266_v39  ;;  %v924_v25 = vadd.f32 %v922_v62, %v918_v9 }
 0x148   :  { %v892_v20 = vadd.f32 %v3005_v8, %v888_v48  ;;  %1279 = vtanh.f32 %v857_v36  ;;  %1126 = vst [vmem:[%s2974_s16 + $0x18] sm:$0xff] %v641_v49  ;;  %v715_v56 = vmul.f32 0.5, %v713_v40  ;;  %v823_v3 = vadd.f32 1.0, %v1268_v14 }
 0x149   :  { %v3007_v37 = vmov %v2998_v53  ;;  %1133 = vst [vmem:[%s2974_s16 + $0x28] sm:$0xff] %v678_v22  ;;  %v788_v1 = vmul.f32 0.5, %v786_v23  ;;  %v3011_v63 = vstv %s3006_s27  ;;  %v3012_v17 = vmov %v3001_v61 }
 0x14a   :  { %v894_v52 = vmul.f32 0.5, %v892_v20  ;;  %v911_v19 = vmul.f32 %v2392_v35, %v3007_v37  ;;  %v928_v57 = vadd.f32 %v3011_v63, %v924_v25  ;;  %v917_v46 = vmul.f32 %v2406_v27, %v3012_v17  ;;  %1140 = vst [vmem:[%s2974_s16 + $0x38] sm:$0xff] %v715_v56 }
 0x14b   :  { %v3014_v42 = vmov %v3002_v13  ;;  %v750_v58 = vadd.f32 1.0, %v1270_v32  ;;  %v825_v28 = vmul.f32 0.5, %v823_v3  ;;  %1153 = vst [vmem:[%s2974_s16 + $0x50] sm:$0xff] %v788_v1  ;;  %v3015_v0 = vstv %s3008_s6 }
 0x14c   :  { %v923_v33 = vmul.f32 %v2420_v55, %v3014_v42  ;;  %1281 = vtanh.f32 %v894_v52  ;;  %v913_v12 = vadd.f32 %v911_v19, %v907_v7  ;;  %v930_v2 = vmul.f32 0.5, %v928_v57 }
 0x14d   :  { %v943_v30 = vmul.f32 %v2221_v34, %v3015_v0  ;;  %v3016_v43 = vstv %s3009_s0  ;;  %v3017_v53 = vstv %s3010_s9  ;;  %v752_v6 = vmul.f32 0.5, %v750_v58  ;;  %1160 = vst [vmem:[%s2974_s16 + $0x60] sm:$0xff] %v825_v28  ;;  %v1272_v34 = vpop.eup %1271 }
 0x14e   :  { %v947_v44 = vmul.f32 %v2231_v47, %v3016_v43  ;;  %v953_v5 = vmul.f32 %v2245_v21, %v3017_v53  ;;  %v919_v31 = vadd.f32 %v917_v46, %v913_v12  ;;  %v3018_v4 = vstv %s3013_s11  ;;  %v1274_v15 = vpop.eup %1273 }
 0x14f   :  { %v959_v59 = vmul.f32 %v2247_v16, %v3018_v4  ;;  %v3019_v61 = vmov %v3015_v0  ;;  %1283 = vtanh.f32 %v930_v2  ;;  %v3020_v13 = vmov %v3016_v43  ;;  %1147 = vst [vmem:[%s2974_s16 + $0x48] sm:$0xff] %v752_v6  ;;  %v1276_v24 = vpop.eup %1275 }
 0x150   :  { %v944_v51 = vmul.f32 %v2382_v26, %v3019_v61  ;;  %v949_v47 = vadd.f32 %v947_v44, %v943_v30  ;;  %v948_v21 = vmul.f32 %v2392_v35, %v3020_v13  ;;  %v3021_v62 = vmov %v3017_v53 }
 0x151   :  { %v954_v50 = vmul.f32 %v2406_v27, %v3021_v62  ;;  %v860_v16 = vadd.f32 1.0, %v1272_v34  ;;  %v925_v10 = vadd.f32 %v923_v33, %v919_v31  ;;  %v787_v54 = vadd.f32 1.0, %v1274_v15 }
 0x152   :  { %v955_v26 = vadd.f32 %v953_v5, %v949_v47  ;;  %v950_v29 = vadd.f32 %v948_v21, %v944_v51  ;;  %v3022_v11 = vmov %v3018_v4  ;;  %v3023_v41 = vmov %v3011_v63 }
 0x153   :  { %v960_v38 = vmul.f32 %v2420_v55, %v3022_v11  ;;  %v862_v48 = vmul.f32 0.5, %v860_v16  ;;  %v929_v35 = vadd.f32 %v3023_v41, %v925_v10  ;;  %v964_v7 = vstv %s2573_s12  ;;  %v1278_v9 = vpop.eup %1277 }
 0x154   :  { %v789_v18 = vmul.f32 0.5, %v787_v54  ;;  %v824_v27 = vadd.f32 1.0, %v1276_v24  ;;  %v961_v60 = vadd.f32 %v959_v59, %v955_v26  ;;  %v956_v45 = vadd.f32 %v954_v50, %v950_v29 }
 0x155   :  { %1167 = vst [vmem:[%s2974_s16 + $0x70] sm:$0xff] %v862_v48  ;;  %v931_v36 = vmul.f32 0.5, %v929_v35  ;;  %v1280_v40 = vpop.eup %1279  ;;  %v897_v8 = vadd.f32 1.0, %v1278_v9 }
 0x156   :  { %1154 = vst [vmem:[%s2974_s16 + $0x58] sm:$0xff] %v789_v18  ;;  %v826_v55 = vmul.f32 0.5, %v824_v27  ;;  %v965_v39 = vadd.f32 %v964_v7, %v961_v60  ;;  %v962_v49 = vadd.f32 %v960_v38, %v956_v45  ;;  %v861_v20 = vadd.f32 1.0, %v1280_v40 }
 0x157   :  { %1285 = vtanh.f32 %v931_v36  ;;  %v899_v23 = vmul.f32 0.5, %v897_v8 }
 0x158   :  { %1161 = vst [vmem:[%s2974_s16 + $0x68] sm:$0xff] %v826_v55  ;;  %v967_v14 = vmul.f32 0.5, %v965_v39  ;;  %v966_v22 = vadd.f32 %v964_v7, %v962_v49  ;;  %v863_v56 = vmul.f32 0.5, %v861_v20 }
 0x159   :  { %v1282_v25 = vpop.eup %1281  ;;  %1174 = vst [vmem:[%s2974_s16 + $0x80] sm:$0xff] %v899_v23 }
 0x15a   :  { %1287 = vtanh.f32 %v967_v14  ;;  %v968_v3 = vmul.f32 0.5, %v966_v22  ;;  %v898_v52 = vadd.f32 1.0, %v1282_v25  ;;  %1168 = vst [vmem:[%s2974_s16 + $0x78] sm:$0xff] %v863_v56 }
 0x15c   :  { %1289 = vtanh.f32 %v968_v3  ;;  %v1284_v37 = vpop.eup %1283  ;;  %v900_v19 = vmul.f32 0.5, %v898_v52 }
 0x15d   :  { %v934_v32 = vadd.f32 1.0, %v1284_v37 }
 0x15e   :  { %1175 = vst [vmem:[%s2974_s16 + $0x88] sm:$0xff] %v900_v19 }
 0x15f   :  { %v936_v1 = vmul.f32 0.5, %v934_v32 }
 0x161   :  { %1181 = vst [vmem:[%s2974_s16 + $0x90] sm:$0xff] %v936_v1 }
 0x164   :  { %v1286_v63 = vpop.eup %1285 }
 0x165   :  { %v935_v57 = vadd.f32 1.0, %v1286_v63 }
 0x167   :  { %v1288_v17 = vpop.eup %1287  ;;  %v937_v46 = vmul.f32 0.5, %v935_v57 }
 0x168   :  { %v971_v42 = vadd.f32 1.0, %v1288_v17 }
 0x169   :  { %v1290_v33 = vpop.eup %1289  ;;  %1182 = vst [vmem:[%s2974_s16 + $0x98] sm:$0xff] %v937_v46 }
 0x16a   :  { %v973_v58 = vmul.f32 0.5, %v971_v42  ;;  %v972_v28 = vadd.f32 1.0, %v1290_v33 }
 0x16c   :  { %1188 = vst [vmem:[%s2974_s16 + $0xa0] sm:$0xff] %v973_v58  ;;  %v974_v12 = vmul.f32 0.5, %v972_v28 }
 0x16e   :  { %1189 = vst [vmem:[%s2974_s16 + $0xa8] sm:$0xff] %v974_v12 }
 0x16f   :  { %986 = vsyncpa [#allocation3], 1 }

</bundles_post_ra>
